<compile_context>
chip_gen: v7x
topology: tpu7x:2x2x1
jax: 0.10.0
libtpu: 0.0.40
codegen_flags: <defaults>
</compile_context>

<pallas_src>
import functools

import jax
import jax.numpy as jnp
from jax.experimental import pallas as pl
from jax.experimental.pallas import tpu as pltpu

NUM_FILTERS = 4


# ---------------------------------------------------------------------------
# The single fused kernel (one batch tile per grid step)
# ---------------------------------------------------------------------------
def _make_nasrwb_kernel(n_grad, n_inter):
    """Builds a fused kernel for a fixed number of gradient / inter-out branches."""

    def kernel(*refs):
        refs = list(refs)
        o_ref = refs.pop()            # output tile: (TB, 1)
        it = iter(refs)

        # ---- per-sample inputs (one batch tile each) ------------------------
        label = next(it)[...]                                   # (TB, C)
        loss = next(it)[...]                                    # (TB, 1)
        g_flats = [next(it)[...] for _ in range(n_grad)]        # (TB, L_i*K_i)
        inters = [next(it)[...] for _ in range(n_inter)]        # (TB, sz_i)

        # ---- weights (resident across the batch grid) -----------------------
        conv_ws = [(next(it)[...], next(it)[...]) for _ in range(n_grad)]
        w1_label, b1_label = next(it)[...], next(it)[...]
        w1_loss, b1_loss = next(it)[...], next(it)[...]
        w1_grads = [(next(it)[...], next(it)[...]) for _ in range(n_grad)]
        w1_inters = [(next(it)[...], next(it)[...]) for _ in range(n_inter)]
        w2_stack = next(it)           # Ref (nb, 128, 64)  -> per-branch slices
        b2_stack = next(it)           # Ref (nb, 1, 64)
        we1_stack = next(it)          # Ref (nb, 64, 256)  -> per-branch slices
        be1 = next(it)[...]           # (1, 256)
        we2, be2 = next(it)[...], next(it)[...]
        we3, be3 = next(it)[...], next(it)[...]
        we4_row, be4 = next(it)[...], next(it)[...]             # (1, 64), (1, 1)

        relu = lambda v: jnp.maximum(v, 0.0)
        # Cast activations to the stored weight dtype at the MXU input; keep the
        # accumulation / bias-add / ReLU in f32.
        dot = lambda a, b: jnp.dot(a.astype(b.dtype), b,
                                   preferred_element_type=jnp.float32)

        # ---- stage 1: per-branch (in -> 128) hidden states, kept in vregs ---
        hiddens = []

        # label component (out1): tiny K -> VPU broadcast FMAs, no MXU push
        C = label.shape[1]
        if C <= 8:
            hl = b1_label
            for c in range(C):
                hl = hl + label[:, c:c + 1] * w1_label[c:c + 1, :]
        else:
            hl = dot(label, w1_label) + b1_label
        hiddens.append(relu(hl))

        # loss component (out2): K=1 contraction as a VPU broadcast outer product
        hiddens.append(relu(loss * w1_loss + b1_loss))

        # gradient components (out3): block-diag conv matmul + permuted-row FC
        for g_flat, (wc_big, bc_t), (w1g, b1g) in zip(g_flats, conv_ws, w1_grads):
            c_act = relu(dot(g_flat, wc_big) + bc_t)            # (TB, 4*L_i)
            hiddens.append(relu(dot(c_act, w1g) + b1g))

        # intermediate-output components (out4)
        for x, (w1o, b1o) in zip(inters, w1_inters):
            hiddens.append(relu(dot(x, w1o) + b1o))

        # ---- stage 2 + encoder layer 1, fused per branch ---------------------
        # Each (TB,128) hidden goes straight into its own dense 128->64 matmul
        # (no zero-padded block-diag weight), and the 64-wide result feeds its
        # (64,256) row-block of the encoder's first Linear, accumulated in
        # registers -> no concatenate, no scratch slab.
        e1 = be1                                                # (1, 256) -> bcast
        for i, h in enumerate(hiddens):
            out_i = relu(dot(h, w2_stack[i]) + b2_stack[i])     # (TB, 64)
            e1 = e1 + dot(out_i, we1_stack[i])                  # (TB, 256)
        e = relu(e1)

        # ---- encoder tail ----------------------------------------------------
        e = relu(dot(e, we2) + be2)                             # (TB, 128)
        e = relu(dot(e, we3) + be3)                             # (TB, 64)
        # Final 64->1 layer on the VPU/XLU (broadcast mul + lane reduction)
        z = jnp.sum(e * we4_row, axis=-1, keepdims=True) + be4  # (TB, 1)
        # Sigmoid; pl.reciprocal(approx=True) deviates ~1e-4 rel. from exact.
        o_ref[...] = pl.reciprocal(1.0 + jnp.exp(-z), approx=True)

    return kernel


# ---------------------------------------------------------------------------
# Forward pass (single pallas_call with a batch grid)
# ---------------------------------------------------------------------------
def _round_up(x, m):
    return (x + m - 1) // m * m


@functools.partial(jax.jit, static_argnames=("batch_tile",))
def nasrwb_forward(params, inter_outs, loss, label, gradients, batch_tile=256):
    B = label.shape[0]
    n_grad = len(gradients)
    n_inter = len(inter_outs)

    # Input-side reshapes only (views): NCHW (B,1,L,K) -> (B, L*K); loss -> (B,1)
    g_flats = [g.reshape(B, -1) for g in gradients]
    loss2d = loss.reshape(B, 1)

    # Batch tile: >=8 sublanes, up to `batch_tile` samples per grid step.
    TB = min(batch_tile, _round_up(B, 8))
    PB = _round_up(B, TB)

    def pad_b(x):
        return x if PB == B else jnp.pad(x, ((0, PB - B), (0, 0)))

    data = ([pad_b(label), pad_b(loss2d)]
            + [pad_b(g) for g in g_flats]
            + [pad_b(x) for x in inter_outs])

    weights = []
    for wc_big, bc_t in params["conv"]:
        weights += [wc_big, bc_t]
    weights += list(params["label1"])
    weights += list(params["loss1"])
    for w1, b1 in params["grad1"]:
        weights += [w1, b1]
    for w1, b1 in params["inter1"]:
        weights += [w1, b1]
    weights += list(params["stage2"])
    weights += list(params["encoder"])

    def batch_spec(x):
        nd = x.ndim
        return pl.BlockSpec((TB,) + x.shape[1:],
                            lambda b, _n=nd: (b,) + (0,) * (_n - 1))

    def full_spec(x):
        nd = x.ndim
        return pl.BlockSpec(x.shape, lambda b, _n=nd: (0,) * _n)

    in_specs = [batch_spec(x) for x in data] + [full_spec(w) for w in weights]

    out = pl.pallas_call(
        _make_nasrwb_kernel(n_grad, n_inter),
        grid=(PB // TB,),
        out_shape=jax.ShapeDtypeStruct((PB, 1), jnp.float32),
        in_specs=in_specs,
        out_specs=pl.BlockSpec((TB, 1), lambda b: (b, 0)),
        compiler_params=pltpu.CompilerParams(
            dimension_semantics=("parallel",)),   # v7x: both TCs split the batch
    )(*data, *weights)
    return out[:B]


# ---------------------------------------------------------------------------
# Parameter construction (PyTorch layout) + one-time repack for the kernel
# ---------------------------------------------------------------------------
def _linear_params(key, d_in, d_out):
    kw, kb = jax.random.split(key)
    scale = 1.0 / jnp.sqrt(jnp.float32(d_in))
    w = jax.random.uniform(kw, (d_in, d_out), jnp.float32, -scale, scale)
    b = jax.random.uniform(kb, (d_out,), jnp.float32, -scale, scale)
    return w, b


def init_nasrwb_raw(key, num_classes, output_size_list, layer_size_list,
                    kernel_size_list):
    """Synthetic weights in the original (PyTorch-equivalent) layout."""
    keys = iter(jax.random.split(key, 128))
    raw = {}
    raw["label"] = (*_linear_params(next(keys), num_classes, 128),
                    *_linear_params(next(keys), 128, 64))
    raw["loss"] = (*_linear_params(next(keys), 1, 128),
                   *_linear_params(next(keys), 128, 64))
    raw["grad"] = []
    for L, K in zip(layer_size_list, kernel_size_list):
        cscale = 1.0 / jnp.sqrt(jnp.float32(K))
        wc = jax.random.uniform(next(keys), (K, NUM_FILTERS), jnp.float32,
                                -cscale, cscale)
        bc = jax.random.uniform(next(keys), (NUM_FILTERS,), jnp.float32,
                                -cscale, cscale)
        fc = (*_linear_params(next(keys), NUM_FILTERS * L, 128),
              *_linear_params(next(keys), 128, 64))
        raw["grad"].append((wc, bc, fc))
    raw["output"] = []
    for sz in output_size_list:
        raw["output"].append((*_linear_params(next(keys), sz, 128),
                              *_linear_params(next(keys), 128, 64)))
    enc_in = 64 * (2 + len(layer_size_list) + len(output_size_list))
    raw["encoder"] = (*_linear_params(next(keys), enc_in, 256),
                      *_linear_params(next(keys), 256, 128),
                      *_linear_params(next(keys), 128, 64),
                      *_linear_params(next(keys), 64, 1))
    return raw


def pack_nasrwb_params(raw, layer_size_list, param_dtype=jnp.float32):
    """One-time, host-side repack into the fused-kernel layout.

    param_dtype=jnp.bfloat16 halves MXU-weight DMA bytes (~1e-3 extra rel.
    error through the encoder chain); f32 keeps the forward numerically
    identical to PyTorch.
    """
    row = lambda b: b[None, :]
    cast = lambda w: w.astype(param_dtype)          # MXU-bound weights only
    conv, grad1, inter1 = [], [], []
    s2_w, s2_b = [], []

    # Branch order must match the PyTorch cat: label, loss, grads..., inters...
    w1, b1, w2, b2 = raw["label"]
    label1 = (w1, row(b1)); s2_w.append(w2); s2_b.append(b2)   # VPU path -> f32

    w1, b1, w2, b2 = raw["loss"]
    loss1 = (w1, row(b1)); s2_w.append(w2); s2_b.append(b2)    # VPU path -> f32

    for (wc, bc, (w1, b1, w2, b2)), L in zip(raw["grad"], layer_size_list):
        # Conv2d(1, F, (1, K)) as one (B, L*K) @ (L*K, L*F) block-diag matmul.
        # (For large L, fold L into rows at the wrapper instead of kron.)
        conv.append((cast(jnp.kron(jnp.eye(L, dtype=jnp.float32), wc)),
                     row(jnp.tile(bc, L))))
        # Fold PyTorch's channel-major Flatten (row index c*L + l) into an
        # L-major (l*F + c) row permutation of the FC weight.
        w1p = (w1.reshape(NUM_FILTERS, L, 128)
                 .transpose(1, 0, 2)
                 .reshape(NUM_FILTERS * L, 128))
        grad1.append((cast(w1p), row(b1)))
        s2_w.append(w2); s2_b.append(b2)

    for (w1, b1, w2, b2) in raw["output"]:
        inter1.append((cast(w1), row(b1)))
        s2_w.append(w2); s2_b.append(b2)

    nb = len(s2_w)
    # Dense per-branch stacks (no zero-padded block-diagonal weight).
    w2_stack = cast(jnp.stack(s2_w))                       # (nb, 128, 64)
    b2_stack = jnp.stack([row(b) for b in s2_b])           # (nb, 1, 64)

    we1, be1, we2, be2, we3, be3, we4, be4 = raw["encoder"]
    we1_stack = cast(we1.reshape(nb, 64, 256))             # per-branch row blocks
    encoder = (we1_stack, row(be1),
               cast(we2), row(be2),
               cast(we3), row(be3),
               we4.T,                                      # (1, 64) VPU row, f32
               be4[None, :])                               # (1, 1)

    return {"conv": conv, "label1": label1, "loss1": loss1, "grad1": grad1,
            "inter1": inter1, "stage2": (w2_stack, b2_stack), "encoder": encoder}


# ---------------------------------------------------------------------------
# Pure-JAX reference (mirrors the PyTorch module exactly, raw weights)
# ---------------------------------------------------------------------------
def nasrwb_reference(raw, inter_outs, loss, label, gradients):
    def mlp2(x, w1, b1, w2, b2):
        h = jnp.maximum(x @ w1 + b1, 0.0)
        return jnp.maximum(h @ w2 + b2, 0.0)

    out1 = mlp2(label, *raw["label"])
    out2 = mlp2(loss[:, None], *raw["loss"])
    out3 = []
    for g, (wc, bc, fc) in zip(gradients, raw["grad"]):
        B, _, L, K = g.shape
        y = jnp.maximum(g.reshape(B * L, K) @ wc + bc, 0.0)          # (B*L, 4)
        y = (y.reshape(B, L, NUM_FILTERS).transpose(0, 2, 1)
              .reshape(B, NUM_FILTERS * L))                          # channel-major flatten
        out3.append(mlp2(y, *fc))
    out4 = [mlp2(x, *p) for x, p in zip(inter_outs, raw["output"])]
    feat = jnp.concatenate([out1, out2, *out3, *out4], axis=1)
    we1, be1, we2, be2, we3, be3, we4, be4 = raw["encoder"]
    e = jnp.maximum(feat @ we1 + be1, 0.0)
    e = jnp.maximum(e @ we2 + be2, 0.0)
    e = jnp.maximum(e @ we3 + be3, 0.0)
    return jax.nn.sigmoid(e @ we4 + be4)


# ---------------------------------------------------------------------------
if __name__ == "__main__":
    num_classes = 4
    output_size_list = [32, 16]
    layer_size_list = [8, 6]
    kernel_size_list = [16, 12]

    root = jax.random.PRNGKey(0)
    k_par, k_dat = jax.random.split(root)

    raw = init_nasrwb_raw(k_par, num_classes, output_size_list,
                          layer_size_list, kernel_size_list)
    params = pack_nasrwb_params(raw, layer_size_list)   # f32 (exact); bf16 optional

    def make_inputs(key, B):
        k_lab, k_loss, k_g0, k_g1, k_i0, k_i1 = jax.random.split(key, 6)
        label = jax.random.normal(k_lab, (B, num_classes), jnp.float32)
        loss = jax.random.uniform(k_loss, (B,), jnp.float32)
        gradients = [
            jax.random.normal(k_g0, (B, 1, layer_size_list[0],
                                     kernel_size_list[0]), jnp.float32),
            jax.random.normal(k_g1, (B, 1, layer_size_list[1],
                                     kernel_size_list[1]), jnp.float32),
        ]
        inter_outs = [
            jax.random.normal(k_i0, (B, output_size_list[0]), jnp.float32),
            jax.random.normal(k_i1, (B, output_size_list[1]), jnp.float32),
        ]
        return inter_outs, loss, label, gradients

    # 1) Small-batch check (B=2, single batch tile).
    B = 2
    inter_outs, loss, label, gradients = make_inputs(k_dat, B)
    out = jax.block_until_ready(
        nasrwb_forward(params, inter_outs, loss, label, gradients))
    ref = jax.block_until_ready(
        nasrwb_reference(raw, inter_outs, loss, label, gradients))
    assert out.shape == (B, 1)
    assert bool(jnp.all((out >= 0.0) & (out <= 1.0)))
    assert bool(jnp.all(jnp.abs(out - ref) < 2e-3)), (out, ref)

    # 2) Multi-tile batch-grid check (pads B and iterates/shards batch tiles).
    B2 = 20
    inter_outs2, loss2, label2, gradients2 = make_inputs(
        jax.random.PRNGKey(7), B2)
    out2 = jax.block_until_ready(
        nasrwb_forward(params, inter_outs2, loss2, label2, gradients2,
                       batch_tile=8))
    ref2 = jax.block_until_ready(
        nasrwb_reference(raw, inter_outs2, loss2, label2, gradients2))
    assert out2.shape == (B2, 1)
    assert bool(jnp.all(jnp.abs(out2 - ref2) < 2e-3)), (out2, ref2)

    print("KERNEL_OK")
</pallas_src>

<mosaic_0001>
module attributes {stable_mosaic.version = 11 : i64} {
  func.func @kernel(%arg0: i32, %arg1: memref<8x4xf32, #tpu.memory_space<vmem>>, %arg2: memref<8x1xf32, #tpu.memory_space<vmem>>, %arg3: memref<8x128xf32, #tpu.memory_space<vmem>>, %arg4: memref<8x72xf32, #tpu.memory_space<vmem>>, %arg5: memref<8x32xf32, #tpu.memory_space<vmem>>, %arg6: memref<8x16xf32, #tpu.memory_space<vmem>>, %arg7: memref<128x32xf32, #tpu.memory_space<vmem>>, %arg8: memref<1x32xf32, #tpu.memory_space<vmem>>, %arg9: memref<72x24xf32, #tpu.memory_space<vmem>>, %arg10: memref<1x24xf32, #tpu.memory_space<vmem>>, %arg11: memref<4x128xf32, #tpu.memory_space<vmem>>, %arg12: memref<1x128xf32, #tpu.memory_space<vmem>>, %arg13: memref<1x128xf32, #tpu.memory_space<vmem>>, %arg14: memref<1x128xf32, #tpu.memory_space<vmem>>, %arg15: memref<32x128xf32, #tpu.memory_space<vmem>>, %arg16: memref<1x128xf32, #tpu.memory_space<vmem>>, %arg17: memref<24x128xf32, #tpu.memory_space<vmem>>, %arg18: memref<1x128xf32, #tpu.memory_space<vmem>>, %arg19: memref<32x128xf32, #tpu.memory_space<vmem>>, %arg20: memref<1x128xf32, #tpu.memory_space<vmem>>, %arg21: memref<16x128xf32, #tpu.memory_space<vmem>>, %arg22: memref<1x128xf32, #tpu.memory_space<vmem>>, %arg23: memref<6x128x64xf32, #tpu.memory_space<vmem>>, %arg24: memref<6x1x64xf32, #tpu.memory_space<vmem>>, %arg25: memref<6x64x256xf32, #tpu.memory_space<vmem>>, %arg26: memref<1x256xf32, #tpu.memory_space<vmem>>, %arg27: memref<256x128xf32, #tpu.memory_space<vmem>>, %arg28: memref<1x128xf32, #tpu.memory_space<vmem>>, %arg29: memref<128x64xf32, #tpu.memory_space<vmem>>, %arg30: memref<1x64xf32, #tpu.memory_space<vmem>>, %arg31: memref<1x64xf32, #tpu.memory_space<vmem>>, %arg32: memref<1x1xf32, #tpu.memory_space<vmem>>, %arg33: memref<8x1xf32, #tpu.memory_space<vmem>>) attributes {dimension_semantics = [#tpu.dimension_semantics<parallel>], iteration_bounds = array<i64: 1>, scalar_prefetch = 0 : i64, scratch_operands = 0 : i64, tpu.core_type = #tpu.core_type<tc>, window_params = [{transform_indices = @transform_0, window_bounds = array<i64: 8, 4>}, {transform_indices = @transform_1, window_bounds = array<i64: 8, 1>}, {transform_indices = @transform_2, window_bounds = array<i64: 8, 128>}, {transform_indices = @transform_3, window_bounds = array<i64: 8, 72>}, {transform_indices = @transform_4, window_bounds = array<i64: 8, 32>}, {transform_indices = @transform_5, window_bounds = array<i64: 8, 16>}, {pipeline_mode = #tpu.pipeline_mode<synchronous>, transform_indices = @transform_6, window_bounds = array<i64: 128, 32>}, {pipeline_mode = #tpu.pipeline_mode<synchronous>, transform_indices = @transform_7, window_bounds = array<i64: 1, 32>}, {pipeline_mode = #tpu.pipeline_mode<synchronous>, transform_indices = @transform_8, window_bounds = array<i64: 72, 24>}, {pipeline_mode = #tpu.pipeline_mode<synchronous>, transform_indices = @transform_9, window_bounds = array<i64: 1, 24>}, {pipeline_mode = #tpu.pipeline_mode<synchronous>, transform_indices = @transform_10, window_bounds = array<i64: 4, 128>}, {pipeline_mode = #tpu.pipeline_mode<synchronous>, transform_indices = @transform_11, window_bounds = array<i64: 1, 128>}, {pipeline_mode = #tpu.pipeline_mode<synchronous>, transform_indices = @transform_12, window_bounds = array<i64: 1, 128>}, {pipeline_mode = #tpu.pipeline_mode<synchronous>, transform_indices = @transform_13, window_bounds = array<i64: 1, 128>}, {pipeline_mode = #tpu.pipeline_mode<synchronous>, transform_indices = @transform_14, window_bounds = array<i64: 32, 128>}, {pipeline_mode = #tpu.pipeline_mode<synchronous>, transform_indices = @transform_15, window_bounds = array<i64: 1, 128>}, {pipeline_mode = #tpu.pipeline_mode<synchronous>, transform_indices = @transform_16, window_bounds = array<i64: 24, 128>}, {pipeline_mode = #tpu.pipeline_mode<synchronous>, transform_indices = @transform_17, window_bounds = array<i64: 1, 128>}, {pipeline_mode = #tpu.pipeline_mode<synchronous>, transform_indices = @transform_18, window_bounds = array<i64: 32, 128>}, {pipeline_mode = #tpu.pipeline_mode<synchronous>, transform_indices = @transform_19, window_bounds = array<i64: 1, 128>}, {pipeline_mode = #tpu.pipeline_mode<synchronous>, transform_indices = @transform_20, window_bounds = array<i64: 16, 128>}, {pipeline_mode = #tpu.pipeline_mode<synchronous>, transform_indices = @transform_21, window_bounds = array<i64: 1, 128>}, {pipeline_mode = #tpu.pipeline_mode<synchronous>, transform_indices = @transform_22, window_bounds = array<i64: 6, 128, 64>}, {pipeline_mode = #tpu.pipeline_mode<synchronous>, transform_indices = @transform_23, window_bounds = array<i64: 6, 1, 64>}, {pipeline_mode = #tpu.pipeline_mode<synchronous>, transform_indices = @transform_24, window_bounds = array<i64: 6, 64, 256>}, {pipeline_mode = #tpu.pipeline_mode<synchronous>, transform_indices = @transform_25, window_bounds = array<i64: 1, 256>}, {pipeline_mode = #tpu.pipeline_mode<synchronous>, transform_indices = @transform_26, window_bounds = array<i64: 256, 128>}, {pipeline_mode = #tpu.pipeline_mode<synchronous>, transform_indices = @transform_27, window_bounds = array<i64: 1, 128>}, {pipeline_mode = #tpu.pipeline_mode<synchronous>, transform_indices = @transform_28, window_bounds = array<i64: 128, 64>}, {pipeline_mode = #tpu.pipeline_mode<synchronous>, transform_indices = @transform_29, window_bounds = array<i64: 1, 64>}, {pipeline_mode = #tpu.pipeline_mode<synchronous>, transform_indices = @transform_30, window_bounds = array<i64: 1, 64>}, {pipeline_mode = #tpu.pipeline_mode<synchronous>, transform_indices = @transform_31, window_bounds = array<i64: 1, 1>}, {transform_indices = @transform_32, window_bounds = array<i64: 8, 1>}]} {
    %c0 = arith.constant 0 : index
    %c0_0 = arith.constant 0 : index
    %0 = vector.load %arg1[%c0, %c0_0] : memref<8x4xf32, #tpu.memory_space<vmem>>, vector<8x4xf32>
    %c0_1 = arith.constant 0 : index
    %c0_2 = arith.constant 0 : index
    %1 = vector.load %arg2[%c0_1, %c0_2] : memref<8x1xf32, #tpu.memory_space<vmem>>, vector<8x1xf32>
    %c0_3 = arith.constant 0 : index
    %c0_4 = arith.constant 0 : index
    %2 = vector.load %arg3[%c0_3, %c0_4] : memref<8x128xf32, #tpu.memory_space<vmem>>, vector<8x128xf32>
    %c0_5 = arith.constant 0 : index
    %c0_6 = arith.constant 0 : index
    %3 = vector.load %arg4[%c0_5, %c0_6] : memref<8x72xf32, #tpu.memory_space<vmem>>, vector<8x72xf32>
    %c0_7 = arith.constant 0 : index
    %c0_8 = arith.constant 0 : index
    %4 = vector.load %arg5[%c0_7, %c0_8] : memref<8x32xf32, #tpu.memory_space<vmem>>, vector<8x32xf32>
    %c0_9 = arith.constant 0 : index
    %c0_10 = arith.constant 0 : index
    %5 = vector.load %arg6[%c0_9, %c0_10] : memref<8x16xf32, #tpu.memory_space<vmem>>, vector<8x16xf32>
    %c0_11 = arith.constant 0 : index
    %c0_12 = arith.constant 0 : index
    %6 = vector.load %arg7[%c0_11, %c0_12] : memref<128x32xf32, #tpu.memory_space<vmem>>, vector<128x32xf32>
    %c0_13 = arith.constant 0 : index
    %c0_14 = arith.constant 0 : index
    %7 = vector.load %arg8[%c0_13, %c0_14] : memref<1x32xf32, #tpu.memory_space<vmem>>, vector<1x32xf32>
    %c0_15 = arith.constant 0 : index
    %c0_16 = arith.constant 0 : index
    %8 = vector.load %arg9[%c0_15, %c0_16] : memref<72x24xf32, #tpu.memory_space<vmem>>, vector<72x24xf32>
    %c0_17 = arith.constant 0 : index
    %c0_18 = arith.constant 0 : index
    %9 = vector.load %arg10[%c0_17, %c0_18] : memref<1x24xf32, #tpu.memory_space<vmem>>, vector<1x24xf32>
    %c0_19 = arith.constant 0 : index
    %c0_20 = arith.constant 0 : index
    %10 = vector.load %arg11[%c0_19, %c0_20] : memref<4x128xf32, #tpu.memory_space<vmem>>, vector<4x128xf32>
    %c0_21 = arith.constant 0 : index
    %c0_22 = arith.constant 0 : index
    %11 = vector.load %arg12[%c0_21, %c0_22] : memref<1x128xf32, #tpu.memory_space<vmem>>, vector<1x128xf32>
    %c0_23 = arith.constant 0 : index
    %c0_24 = arith.constant 0 : index
    %12 = vector.load %arg13[%c0_23, %c0_24] : memref<1x128xf32, #tpu.memory_space<vmem>>, vector<1x128xf32>
    %c0_25 = arith.constant 0 : index
    %c0_26 = arith.constant 0 : index
    %13 = vector.load %arg14[%c0_25, %c0_26] : memref<1x128xf32, #tpu.memory_space<vmem>>, vector<1x128xf32>
    %c0_27 = arith.constant 0 : index
    %c0_28 = arith.constant 0 : index
    %14 = vector.load %arg15[%c0_27, %c0_28] : memref<32x128xf32, #tpu.memory_space<vmem>>, vector<32x128xf32>
    %c0_29 = arith.constant 0 : index
    %c0_30 = arith.constant 0 : index
    %15 = vector.load %arg16[%c0_29, %c0_30] : memref<1x128xf32, #tpu.memory_space<vmem>>, vector<1x128xf32>
    %c0_31 = arith.constant 0 : index
    %c0_32 = arith.constant 0 : index
    %16 = vector.load %arg17[%c0_31, %c0_32] : memref<24x128xf32, #tpu.memory_space<vmem>>, vector<24x128xf32>
    %c0_33 = arith.constant 0 : index
    %c0_34 = arith.constant 0 : index
    %17 = vector.load %arg18[%c0_33, %c0_34] : memref<1x128xf32, #tpu.memory_space<vmem>>, vector<1x128xf32>
    %c0_35 = arith.constant 0 : index
    %c0_36 = arith.constant 0 : index
    %18 = vector.load %arg19[%c0_35, %c0_36] : memref<32x128xf32, #tpu.memory_space<vmem>>, vector<32x128xf32>
    %c0_37 = arith.constant 0 : index
    %c0_38 = arith.constant 0 : index
    %19 = vector.load %arg20[%c0_37, %c0_38] : memref<1x128xf32, #tpu.memory_space<vmem>>, vector<1x128xf32>
    %c0_39 = arith.constant 0 : index
    %c0_40 = arith.constant 0 : index
    %20 = vector.load %arg21[%c0_39, %c0_40] : memref<16x128xf32, #tpu.memory_space<vmem>>, vector<16x128xf32>
    %c0_41 = arith.constant 0 : index
    %c0_42 = arith.constant 0 : index
    %21 = vector.load %arg22[%c0_41, %c0_42] : memref<1x128xf32, #tpu.memory_space<vmem>>, vector<1x128xf32>
    %c0_43 = arith.constant 0 : index
    %c0_44 = arith.constant 0 : index
    %22 = vector.load %arg26[%c0_43, %c0_44] : memref<1x256xf32, #tpu.memory_space<vmem>>, vector<1x256xf32>
    %c0_45 = arith.constant 0 : index
    %c0_46 = arith.constant 0 : index
    %23 = vector.load %arg27[%c0_45, %c0_46] : memref<256x128xf32, #tpu.memory_space<vmem>>, vector<256x128xf32>
    %c0_47 = arith.constant 0 : index
    %c0_48 = arith.constant 0 : index
    %24 = vector.load %arg28[%c0_47, %c0_48] : memref<1x128xf32, #tpu.memory_space<vmem>>, vector<1x128xf32>
    %c0_49 = arith.constant 0 : index
    %c0_50 = arith.constant 0 : index
    %25 = vector.load %arg29[%c0_49, %c0_50] : memref<128x64xf32, #tpu.memory_space<vmem>>, vector<128x64xf32>
    %c0_51 = arith.constant 0 : index
    %c0_52 = arith.constant 0 : index
    %26 = vector.load %arg30[%c0_51, %c0_52] : memref<1x64xf32, #tpu.memory_space<vmem>>, vector<1x64xf32>
    %c0_53 = arith.constant 0 : index
    %c0_54 = arith.constant 0 : index
    %27 = vector.load %arg31[%c0_53, %c0_54] : memref<1x64xf32, #tpu.memory_space<vmem>>, vector<1x64xf32>
    %c0_55 = arith.constant 0 : index
    %c0_56 = arith.constant 0 : index
    %28 = vector.load %arg32[%c0_55, %c0_56] : memref<1x1xf32, #tpu.memory_space<vmem>>, vector<1x1xf32>
    %29 = vector.extract_strided_slice %0 {offsets = [0, 0], sizes = [8, 1], strides = [1, 1]} : vector<8x4xf32> to vector<8x1xf32>
    %30 = vector.extract_strided_slice %10 {offsets = [0, 0], sizes = [1, 128], strides = [1, 1]} : vector<4x128xf32> to vector<1x128xf32>
    %31 = vector.broadcast %29 : vector<8x1xf32> to vector<8x128xf32>
    %32 = vector.broadcast %30 : vector<1x128xf32> to vector<8x128xf32>
    %33 = arith.mulf %31, %32 : vector<8x128xf32>
    %34 = vector.broadcast %11 : vector<1x128xf32> to vector<8x128xf32>
    %35 = arith.addf %34, %33 : vector<8x128xf32>
    %36 = vector.extract_strided_slice %0 {offsets = [0, 1], sizes = [8, 1], strides = [1, 1]} : vector<8x4xf32> to vector<8x1xf32>
    %37 = vector.extract_strided_slice %10 {offsets = [1, 0], sizes = [1, 128], strides = [1, 1]} : vector<4x128xf32> to vector<1x128xf32>
    %38 = vector.broadcast %36 : vector<8x1xf32> to vector<8x128xf32>
    %39 = vector.broadcast %37 : vector<1x128xf32> to vector<8x128xf32>
    %40 = arith.mulf %38, %39 : vector<8x128xf32>
    %41 = arith.addf %35, %40 : vector<8x128xf32>
    %42 = vector.extract_strided_slice %0 {offsets = [0, 2], sizes = [8, 1], strides = [1, 1]} : vector<8x4xf32> to vector<8x1xf32>
    %43 = vector.extract_strided_slice %10 {offsets = [2, 0], sizes = [1, 128], strides = [1, 1]} : vector<4x128xf32> to vector<1x128xf32>
    %44 = vector.broadcast %42 : vector<8x1xf32> to vector<8x128xf32>
    %45 = vector.broadcast %43 : vector<1x128xf32> to vector<8x128xf32>
    %46 = arith.mulf %44, %45 : vector<8x128xf32>
    %47 = arith.addf %41, %46 : vector<8x128xf32>
    %48 = vector.extract_strided_slice %0 {offsets = [0, 3], sizes = [8, 1], strides = [1, 1]} : vector<8x4xf32> to vector<8x1xf32>
    %49 = vector.extract_strided_slice %10 {offsets = [3, 0], sizes = [1, 128], strides = [1, 1]} : vector<4x128xf32> to vector<1x128xf32>
    %50 = vector.broadcast %48 : vector<8x1xf32> to vector<8x128xf32>
    %51 = vector.broadcast %49 : vector<1x128xf32> to vector<8x128xf32>
    %52 = arith.mulf %50, %51 : vector<8x128xf32>
    %53 = arith.addf %47, %52 : vector<8x128xf32>
    %cst = arith.constant 0.000000e+00 : f32
    %54 = vector.broadcast %cst : f32 to vector<8x128xf32>
    %55 = arith.maximumf %53, %54 : vector<8x128xf32>
    %56 = vector.broadcast %1 : vector<8x1xf32> to vector<8x128xf32>
    %57 = vector.broadcast %12 : vector<1x128xf32> to vector<8x128xf32>
    %58 = arith.mulf %56, %57 : vector<8x128xf32>
    %59 = vector.broadcast %13 : vector<1x128xf32> to vector<8x128xf32>
    %60 = arith.addf %58, %59 : vector<8x128xf32>
    %cst_57 = arith.constant 0.000000e+00 : f32
    %61 = vector.broadcast %cst_57 : f32 to vector<8x128xf32>
    %62 = arith.maximumf %60, %61 : vector<8x128xf32>
    %cst_58 = arith.constant dense<0.000000e+00> : vector<8x32xf32>
    %63 = tpu.matmul %2, %6, %cst_58 {dimension_numbers = #tpu.dot_dimension_numbers<[1], [0], [0], [1], [0, 0, 1, 1], [], []>} : vector<8x128xf32>, vector<128x32xf32>, vector<8x32xf32> -> vector<8x32xf32>
    %64 = vector.broadcast %7 : vector<1x32xf32> to vector<8x32xf32>
    %65 = arith.addf %63, %64 : vector<8x32xf32>
    %cst_59 = arith.constant 0.000000e+00 : f32
    %66 = vector.broadcast %cst_59 : f32 to vector<8x32xf32>
    %67 = arith.maximumf %65, %66 : vector<8x32xf32>
    %cst_60 = arith.constant dense<0.000000e+00> : vector<8x128xf32>
    %68 = tpu.matmul %67, %14, %cst_60 {dimension_numbers = #tpu.dot_dimension_numbers<[1], [0], [0], [1], [0, 0, 1, 1], [], []>} : vector<8x32xf32>, vector<32x128xf32>, vector<8x128xf32> -> vector<8x128xf32>
    %69 = vector.broadcast %15 : vector<1x128xf32> to vector<8x128xf32>
    %70 = arith.addf %68, %69 : vector<8x128xf32>
    %cst_61 = arith.constant 0.000000e+00 : f32
    %71 = vector.broadcast %cst_61 : f32 to vector<8x128xf32>
    %72 = arith.maximumf %70, %71 : vector<8x128xf32>
    %cst_62 = arith.constant dense<0.000000e+00> : vector<8x24xf32>
    %73 = tpu.matmul %3, %8, %cst_62 {dimension_numbers = #tpu.dot_dimension_numbers<[1], [0], [0], [1], [0, 0, 1, 1], [], []>} : vector<8x72xf32>, vector<72x24xf32>, vector<8x24xf32> -> vector<8x24xf32>
    %74 = vector.broadcast %9 : vector<1x24xf32> to vector<8x24xf32>
    %75 = arith.addf %73, %74 : vector<8x24xf32>
    %cst_63 = arith.constant 0.000000e+00 : f32
    %76 = vector.broadcast %cst_63 : f32 to vector<8x24xf32>
    %77 = arith.maximumf %75, %76 : vector<8x24xf32>
    %cst_64 = arith.constant dense<0.000000e+00> : vector<8x128xf32>
    %78 = tpu.matmul %77, %16, %cst_64 {dimension_numbers = #tpu.dot_dimension_numbers<[1], [0], [0], [1], [0, 0, 1, 1], [], []>} : vector<8x24xf32>, vector<24x128xf32>, vector<8x128xf32> -> vector<8x128xf32>
    %79 = vector.broadcast %17 : vector<1x128xf32> to vector<8x128xf32>
    %80 = arith.addf %78, %79 : vector<8x128xf32>
    %cst_65 = arith.constant 0.000000e+00 : f32
    %81 = vector.broadcast %cst_65 : f32 to vector<8x128xf32>
    %82 = arith.maximumf %80, %81 : vector<8x128xf32>
    %cst_66 = arith.constant dense<0.000000e+00> : vector<8x128xf32>
    %83 = tpu.matmul %4, %18, %cst_66 {dimension_numbers = #tpu.dot_dimension_numbers<[1], [0], [0], [1], [0, 0, 1, 1], [], []>} : vector<8x32xf32>, vector<32x128xf32>, vector<8x128xf32> -> vector<8x128xf32>
    %84 = vector.broadcast %19 : vector<1x128xf32> to vector<8x128xf32>
    %85 = arith.addf %83, %84 : vector<8x128xf32>
    %cst_67 = arith.constant 0.000000e+00 : f32
    %86 = vector.broadcast %cst_67 : f32 to vector<8x128xf32>
    %87 = arith.maximumf %85, %86 : vector<8x128xf32>
    %cst_68 = arith.constant dense<0.000000e+00> : vector<8x128xf32>
    %88 = tpu.matmul %5, %20, %cst_68 {dimension_numbers = #tpu.dot_dimension_numbers<[1], [0], [0], [1], [0, 0, 1, 1], [], []>} : vector<8x16xf32>, vector<16x128xf32>, vector<8x128xf32> -> vector<8x128xf32>
    %89 = vector.broadcast %21 : vector<1x128xf32> to vector<8x128xf32>
    %90 = arith.addf %88, %89 : vector<8x128xf32>
    %cst_69 = arith.constant 0.000000e+00 : f32
    %91 = vector.broadcast %cst_69 : f32 to vector<8x128xf32>
    %92 = arith.maximumf %90, %91 : vector<8x128xf32>
    %c0_70 = arith.constant 0 : index
    %c0_71 = arith.constant 0 : index
    %c0_72 = arith.constant 0 : index
    %93 = vector.load %arg23[%c0_70, %c0_71, %c0_72] : memref<6x128x64xf32, #tpu.memory_space<vmem>>, vector<1x128x64xf32>
    %94 = vector.shape_cast %93 : vector<1x128x64xf32> to vector<128x64xf32>
    %cst_73 = arith.constant dense<0.000000e+00> : vector<8x64xf32>
    %95 = tpu.matmul %55, %94, %cst_73 {dimension_numbers = #tpu.dot_dimension_numbers<[1], [0], [0], [1], [0, 0, 1, 1], [], []>} : vector<8x128xf32>, vector<128x64xf32>, vector<8x64xf32> -> vector<8x64xf32>
    %c0_74 = arith.constant 0 : index
    %c0_75 = arith.constant 0 : index
    %c0_76 = arith.constant 0 : index
    %96 = vector.load %arg24[%c0_74, %c0_75, %c0_76] : memref<6x1x64xf32, #tpu.memory_space<vmem>>, vector<1x1x64xf32>
    %97 = vector.shape_cast %96 : vector<1x1x64xf32> to vector<1x64xf32>
    %98 = vector.broadcast %97 : vector<1x64xf32> to vector<8x64xf32>
    %99 = arith.addf %95, %98 : vector<8x64xf32>
    %cst_77 = arith.constant 0.000000e+00 : f32
    %100 = vector.broadcast %cst_77 : f32 to vector<8x64xf32>
    %101 = arith.maximumf %99, %100 : vector<8x64xf32>
    %c0_78 = arith.constant 0 : index
    %c0_79 = arith.constant 0 : index
    %c0_80 = arith.constant 0 : index
    %102 = vector.load %arg25[%c0_78, %c0_79, %c0_80] : memref<6x64x256xf32, #tpu.memory_space<vmem>>, vector<1x64x256xf32>
    %103 = vector.shape_cast %102 : vector<1x64x256xf32> to vector<64x256xf32>
    %cst_81 = arith.constant dense<0.000000e+00> : vector<8x256xf32>
    %104 = tpu.matmul %101, %103, %cst_81 {dimension_numbers = #tpu.dot_dimension_numbers<[1], [0], [0], [1], [0, 0, 1, 1], [], []>} : vector<8x64xf32>, vector<64x256xf32>, vector<8x256xf32> -> vector<8x256xf32>
    %105 = vector.broadcast %22 : vector<1x256xf32> to vector<8x256xf32>
    %106 = arith.addf %105, %104 : vector<8x256xf32>
    %c1 = arith.constant 1 : index
    %c0_82 = arith.constant 0 : index
    %c0_83 = arith.constant 0 : index
    %107 = vector.load %arg23[%c1, %c0_82, %c0_83] : memref<6x128x64xf32, #tpu.memory_space<vmem>>, vector<1x128x64xf32>
    %108 = vector.shape_cast %107 : vector<1x128x64xf32> to vector<128x64xf32>
    %cst_84 = arith.constant dense<0.000000e+00> : vector<8x64xf32>
    %109 = tpu.matmul %62, %108, %cst_84 {dimension_numbers = #tpu.dot_dimension_numbers<[1], [0], [0], [1], [0, 0, 1, 1], [], []>} : vector<8x128xf32>, vector<128x64xf32>, vector<8x64xf32> -> vector<8x64xf32>
    %c1_85 = arith.constant 1 : index
    %c0_86 = arith.constant 0 : index
    %c0_87 = arith.constant 0 : index
    %110 = vector.load %arg24[%c1_85, %c0_86, %c0_87] : memref<6x1x64xf32, #tpu.memory_space<vmem>>, vector<1x1x64xf32>
    %111 = vector.shape_cast %110 : vector<1x1x64xf32> to vector<1x64xf32>
    %112 = vector.broadcast %111 : vector<1x64xf32> to vector<8x64xf32>
    %113 = arith.addf %109, %112 : vector<8x64xf32>
    %cst_88 = arith.constant 0.000000e+00 : f32
    %114 = vector.broadcast %cst_88 : f32 to vector<8x64xf32>
    %115 = arith.maximumf %113, %114 : vector<8x64xf32>
    %c1_89 = arith.constant 1 : index
    %c0_90 = arith.constant 0 : index
    %c0_91 = arith.constant 0 : index
    %116 = vector.load %arg25[%c1_89, %c0_90, %c0_91] : memref<6x64x256xf32, #tpu.memory_space<vmem>>, vector<1x64x256xf32>
    %117 = vector.shape_cast %116 : vector<1x64x256xf32> to vector<64x256xf32>
    %cst_92 = arith.constant dense<0.000000e+00> : vector<8x256xf32>
    %118 = tpu.matmul %115, %117, %cst_92 {dimension_numbers = #tpu.dot_dimension_numbers<[1], [0], [0], [1], [0, 0, 1, 1], [], []>} : vector<8x64xf32>, vector<64x256xf32>, vector<8x256xf32> -> vector<8x256xf32>
    %119 = arith.addf %106, %118 : vector<8x256xf32>
    %c2 = arith.constant 2 : index
    %c0_93 = arith.constant 0 : index
    %c0_94 = arith.constant 0 : index
    %120 = vector.load %arg23[%c2, %c0_93, %c0_94] : memref<6x128x64xf32, #tpu.memory_space<vmem>>, vector<1x128x64xf32>
    %121 = vector.shape_cast %120 : vector<1x128x64xf32> to vector<128x64xf32>
    %cst_95 = arith.constant dense<0.000000e+00> : vector<8x64xf32>
    %122 = tpu.matmul %72, %121, %cst_95 {dimension_numbers = #tpu.dot_dimension_numbers<[1], [0], [0], [1], [0, 0, 1, 1], [], []>} : vector<8x128xf32>, vector<128x64xf32>, vector<8x64xf32> -> vector<8x64xf32>
    %c2_96 = arith.constant 2 : index
    %c0_97 = arith.constant 0 : index
    %c0_98 = arith.constant 0 : index
    %123 = vector.load %arg24[%c2_96, %c0_97, %c0_98] : memref<6x1x64xf32, #tpu.memory_space<vmem>>, vector<1x1x64xf32>
    %124 = vector.shape_cast %123 : vector<1x1x64xf32> to vector<1x64xf32>
    %125 = vector.broadcast %124 : vector<1x64xf32> to vector<8x64xf32>
    %126 = arith.addf %122, %125 : vector<8x64xf32>
    %cst_99 = arith.constant 0.000000e+00 : f32
    %127 = vector.broadcast %cst_99 : f32 to vector<8x64xf32>
    %128 = arith.maximumf %126, %127 : vector<8x64xf32>
    %c2_100 = arith.constant 2 : index
    %c0_101 = arith.constant 0 : index
    %c0_102 = arith.constant 0 : index
    %129 = vector.load %arg25[%c2_100, %c0_101, %c0_102] : memref<6x64x256xf32, #tpu.memory_space<vmem>>, vector<1x64x256xf32>
    %130 = vector.shape_cast %129 : vector<1x64x256xf32> to vector<64x256xf32>
    %cst_103 = arith.constant dense<0.000000e+00> : vector<8x256xf32>
    %131 = tpu.matmul %128, %130, %cst_103 {dimension_numbers = #tpu.dot_dimension_numbers<[1], [0], [0], [1], [0, 0, 1, 1], [], []>} : vector<8x64xf32>, vector<64x256xf32>, vector<8x256xf32> -> vector<8x256xf32>
    %132 = arith.addf %119, %131 : vector<8x256xf32>
    %c3 = arith.constant 3 : index
    %c0_104 = arith.constant 0 : index
    %c0_105 = arith.constant 0 : index
    %133 = vector.load %arg23[%c3, %c0_104, %c0_105] : memref<6x128x64xf32, #tpu.memory_space<vmem>>, vector<1x128x64xf32>
    %134 = vector.shape_cast %133 : vector<1x128x64xf32> to vector<128x64xf32>
    %cst_106 = arith.constant dense<0.000000e+00> : vector<8x64xf32>
    %135 = tpu.matmul %82, %134, %cst_106 {dimension_numbers = #tpu.dot_dimension_numbers<[1], [0], [0], [1], [0, 0, 1, 1], [], []>} : vector<8x128xf32>, vector<128x64xf32>, vector<8x64xf32> -> vector<8x64xf32>
    %c3_107 = arith.constant 3 : index
    %c0_108 = arith.constant 0 : index
    %c0_109 = arith.constant 0 : index
    %136 = vector.load %arg24[%c3_107, %c0_108, %c0_109] : memref<6x1x64xf32, #tpu.memory_space<vmem>>, vector<1x1x64xf32>
    %137 = vector.shape_cast %136 : vector<1x1x64xf32> to vector<1x64xf32>
    %138 = vector.broadcast %137 : vector<1x64xf32> to vector<8x64xf32>
    %139 = arith.addf %135, %138 : vector<8x64xf32>
    %cst_110 = arith.constant 0.000000e+00 : f32
    %140 = vector.broadcast %cst_110 : f32 to vector<8x64xf32>
    %141 = arith.maximumf %139, %140 : vector<8x64xf32>
    %c3_111 = arith.constant 3 : index
    %c0_112 = arith.constant 0 : index
    %c0_113 = arith.constant 0 : index
    %142 = vector.load %arg25[%c3_111, %c0_112, %c0_113] : memref<6x64x256xf32, #tpu.memory_space<vmem>>, vector<1x64x256xf32>
    %143 = vector.shape_cast %142 : vector<1x64x256xf32> to vector<64x256xf32>
    %cst_114 = arith.constant dense<0.000000e+00> : vector<8x256xf32>
    %144 = tpu.matmul %141, %143, %cst_114 {dimension_numbers = #tpu.dot_dimension_numbers<[1], [0], [0], [1], [0, 0, 1, 1], [], []>} : vector<8x64xf32>, vector<64x256xf32>, vector<8x256xf32> -> vector<8x256xf32>
    %145 = arith.addf %132, %144 : vector<8x256xf32>
    %c4 = arith.constant 4 : index
    %c0_115 = arith.constant 0 : index
    %c0_116 = arith.constant 0 : index
    %146 = vector.load %arg23[%c4, %c0_115, %c0_116] : memref<6x128x64xf32, #tpu.memory_space<vmem>>, vector<1x128x64xf32>
    %147 = vector.shape_cast %146 : vector<1x128x64xf32> to vector<128x64xf32>
    %cst_117 = arith.constant dense<0.000000e+00> : vector<8x64xf32>
    %148 = tpu.matmul %87, %147, %cst_117 {dimension_numbers = #tpu.dot_dimension_numbers<[1], [0], [0], [1], [0, 0, 1, 1], [], []>} : vector<8x128xf32>, vector<128x64xf32>, vector<8x64xf32> -> vector<8x64xf32>
    %c4_118 = arith.constant 4 : index
    %c0_119 = arith.constant 0 : index
    %c0_120 = arith.constant 0 : index
    %149 = vector.load %arg24[%c4_118, %c0_119, %c0_120] : memref<6x1x64xf32, #tpu.memory_space<vmem>>, vector<1x1x64xf32>
    %150 = vector.shape_cast %149 : vector<1x1x64xf32> to vector<1x64xf32>
    %151 = vector.broadcast %150 : vector<1x64xf32> to vector<8x64xf32>
    %152 = arith.addf %148, %151 : vector<8x64xf32>
    %cst_121 = arith.constant 0.000000e+00 : f32
    %153 = vector.broadcast %cst_121 : f32 to vector<8x64xf32>
    %154 = arith.maximumf %152, %153 : vector<8x64xf32>
    %c4_122 = arith.constant 4 : index
    %c0_123 = arith.constant 0 : index
    %c0_124 = arith.constant 0 : index
    %155 = vector.load %arg25[%c4_122, %c0_123, %c0_124] : memref<6x64x256xf32, #tpu.memory_space<vmem>>, vector<1x64x256xf32>
    %156 = vector.shape_cast %155 : vector<1x64x256xf32> to vector<64x256xf32>
    %cst_125 = arith.constant dense<0.000000e+00> : vector<8x256xf32>
    %157 = tpu.matmul %154, %156, %cst_125 {dimension_numbers = #tpu.dot_dimension_numbers<[1], [0], [0], [1], [0, 0, 1, 1], [], []>} : vector<8x64xf32>, vector<64x256xf32>, vector<8x256xf32> -> vector<8x256xf32>
    %158 = arith.addf %145, %157 : vector<8x256xf32>
    %c5 = arith.constant 5 : index
    %c0_126 = arith.constant 0 : index
    %c0_127 = arith.constant 0 : index
    %159 = vector.load %arg23[%c5, %c0_126, %c0_127] : memref<6x128x64xf32, #tpu.memory_space<vmem>>, vector<1x128x64xf32>
    %160 = vector.shape_cast %159 : vector<1x128x64xf32> to vector<128x64xf32>
    %cst_128 = arith.constant dense<0.000000e+00> : vector<8x64xf32>
    %161 = tpu.matmul %92, %160, %cst_128 {dimension_numbers = #tpu.dot_dimension_numbers<[1], [0], [0], [1], [0, 0, 1, 1], [], []>} : vector<8x128xf32>, vector<128x64xf32>, vector<8x64xf32> -> vector<8x64xf32>
    %c5_129 = arith.constant 5 : index
    %c0_130 = arith.constant 0 : index
    %c0_131 = arith.constant 0 : index
    %162 = vector.load %arg24[%c5_129, %c0_130, %c0_131] : memref<6x1x64xf32, #tpu.memory_space<vmem>>, vector<1x1x64xf32>
    %163 = vector.shape_cast %162 : vector<1x1x64xf32> to vector<1x64xf32>
    %164 = vector.broadcast %163 : vector<1x64xf32> to vector<8x64xf32>
    %165 = arith.addf %161, %164 : vector<8x64xf32>
    %cst_132 = arith.constant 0.000000e+00 : f32
    %166 = vector.broadcast %cst_132 : f32 to vector<8x64xf32>
    %167 = arith.maximumf %165, %166 : vector<8x64xf32>
    %c5_133 = arith.constant 5 : index
    %c0_134 = arith.constant 0 : index
    %c0_135 = arith.constant 0 : index
    %168 = vector.load %arg25[%c5_133, %c0_134, %c0_135] : memref<6x64x256xf32, #tpu.memory_space<vmem>>, vector<1x64x256xf32>
    %169 = vector.shape_cast %168 : vector<1x64x256xf32> to vector<64x256xf32>
    %cst_136 = arith.constant dense<0.000000e+00> : vector<8x256xf32>
    %170 = tpu.matmul %167, %169, %cst_136 {dimension_numbers = #tpu.dot_dimension_numbers<[1], [0], [0], [1], [0, 0, 1, 1], [], []>} : vector<8x64xf32>, vector<64x256xf32>, vector<8x256xf32> -> vector<8x256xf32>
    %171 = arith.addf %158, %170 : vector<8x256xf32>
    %cst_137 = arith.constant 0.000000e+00 : f32
    %172 = vector.broadcast %cst_137 : f32 to vector<8x256xf32>
    %173 = arith.maximumf %171, %172 : vector<8x256xf32>
    %cst_138 = arith.constant dense<0.000000e+00> : vector<8x128xf32>
    %174 = tpu.matmul %173, %23, %cst_138 {dimension_numbers = #tpu.dot_dimension_numbers<[1], [0], [0], [1], [0, 0, 1, 1], [], []>} : vector<8x256xf32>, vector<256x128xf32>, vector<8x128xf32> -> vector<8x128xf32>
    %175 = vector.broadcast %24 : vector<1x128xf32> to vector<8x128xf32>
    %176 = arith.addf %174, %175 : vector<8x128xf32>
    %cst_139 = arith.constant 0.000000e+00 : f32
    %177 = vector.broadcast %cst_139 : f32 to vector<8x128xf32>
    %178 = arith.maximumf %176, %177 : vector<8x128xf32>
    %cst_140 = arith.constant dense<0.000000e+00> : vector<8x64xf32>
    %179 = tpu.matmul %178, %25, %cst_140 {dimension_numbers = #tpu.dot_dimension_numbers<[1], [0], [0], [1], [0, 0, 1, 1], [], []>} : vector<8x128xf32>, vector<128x64xf32>, vector<8x64xf32> -> vector<8x64xf32>
    %180 = vector.broadcast %26 : vector<1x64xf32> to vector<8x64xf32>
    %181 = arith.addf %179, %180 : vector<8x64xf32>
    %cst_141 = arith.constant 0.000000e+00 : f32
    %182 = vector.broadcast %cst_141 : f32 to vector<8x64xf32>
    %183 = arith.maximumf %181, %182 : vector<8x64xf32>
    %184 = vector.broadcast %27 : vector<1x64xf32> to vector<8x64xf32>
    %185 = arith.mulf %183, %184 : vector<8x64xf32>
    %cst_142 = arith.constant dense<0.000000e+00> : vector<8xf32>
    %186 = vector.multi_reduction <add>, %185, %cst_142 [1] : vector<8x64xf32> to vector<8xf32>
    %187 = vector.shape_cast %186 : vector<8xf32> to vector<8x1xf32>
    %188 = vector.broadcast %28 : vector<1x1xf32> to vector<8x1xf32>
    %189 = arith.addf %187, %188 : vector<8x1xf32>
    %cst_143 = arith.constant 0.000000e+00 : f32
    %190 = vector.broadcast %cst_143 : f32 to vector<8x1xf32>
    %191 = arith.subf %190, %189 : vector<8x1xf32>
    %192 = math.exp %191 : vector<8x1xf32>
    %cst_144 = arith.constant 1.000000e+00 : f32
    %193 = vector.broadcast %cst_144 : f32 to vector<8x1xf32>
    %194 = arith.addf %193, %192 : vector<8x1xf32>
    %195 = tpu.reciprocal %194 {approx = true} : vector<8x1xf32> -> vector<8x1xf32>
    %c0_145 = arith.constant 0 : index
    %c0_146 = arith.constant 0 : index
    %196 = vector.load %arg33[%c0_145, %c0_146] : memref<8x1xf32, #tpu.memory_space<vmem>>, vector<8x1xf32>
    tpu.vector_store %arg33[%c0_145, %c0_146], %195 {strides = array<i32>} : memref<8x1xf32, #tpu.memory_space<vmem>>, vector<8x1xf32>,
    return
  }
  func.func @transform_0(%arg0: i32) -> (i32, i32) {
    %c0_i32 = arith.constant 0 : i32
    %c0_i32_0 = arith.constant 0 : i32
    return %arg0, %c0_i32 : i32, i32
  }
  func.func @transform_1(%arg0: i32) -> (i32, i32) {
    %c0_i32 = arith.constant 0 : i32
    %c0_i32_0 = arith.constant 0 : i32
    return %arg0, %c0_i32 : i32, i32
  }
  func.func @transform_2(%arg0: i32) -> (i32, i32) {
    %c0_i32 = arith.constant 0 : i32
    %c0_i32_0 = arith.constant 0 : i32
    return %arg0, %c0_i32 : i32, i32
  }
  func.func @transform_3(%arg0: i32) -> (i32, i32) {
    %c0_i32 = arith.constant 0 : i32
    %c0_i32_0 = arith.constant 0 : i32
    return %arg0, %c0_i32 : i32, i32
  }
  func.func @transform_4(%arg0: i32) -> (i32, i32) {
    %c0_i32 = arith.constant 0 : i32
    %c0_i32_0 = arith.constant 0 : i32
    return %arg0, %c0_i32 : i32, i32
  }
  func.func @transform_5(%arg0: i32) -> (i32, i32) {
    %c0_i32 = arith.constant 0 : i32
    %c0_i32_0 = arith.constant 0 : i32
    return %arg0, %c0_i32 : i32, i32
  }
  func.func @transform_6(%arg0: i32) -> (i32, i32) {
    %c0_i32 = arith.constant 0 : i32
    %c0_i32_0 = arith.constant 0 : i32
    %c0_i32_1 = arith.constant 0 : i32
    return %c0_i32, %c0_i32_0 : i32, i32
  }
  func.func @transform_7(%arg0: i32) -> (i32, i32) {
    %c0_i32 = arith.constant 0 : i32
    %c0_i32_0 = arith.constant 0 : i32
    %c0_i32_1 = arith.constant 0 : i32
    return %c0_i32, %c0_i32_0 : i32, i32
  }
  func.func @transform_8(%arg0: i32) -> (i32, i32) {
    %c0_i32 = arith.constant 0 : i32
    %c0_i32_0 = arith.constant 0 : i32
    %c0_i32_1 = arith.constant 0 : i32
    return %c0_i32, %c0_i32_0 : i32, i32
  }
  func.func @transform_9(%arg0: i32) -> (i32, i32) {
    %c0_i32 = arith.constant 0 : i32
    %c0_i32_0 = arith.constant 0 : i32
    %c0_i32_1 = arith.constant 0 : i32
    return %c0_i32, %c0_i32_0 : i32, i32
  }
  func.func @transform_10(%arg0: i32) -> (i32, i32) {
    %c0_i32 = arith.constant 0 : i32
    %c0_i32_0 = arith.constant 0 : i32
    %c0_i32_1 = arith.constant 0 : i32
    return %c0_i32, %c0_i32_0 : i32, i32
  }
  func.func @transform_11(%arg0: i32) -> (i32, i32) {
    %c0_i32 = arith.constant 0 : i32
    %c0_i32_0 = arith.constant 0 : i32
    %c0_i32_1 = arith.constant 0 : i32
    return %c0_i32, %c0_i32_0 : i32, i32
  }
  func.func @transform_12(%arg0: i32) -> (i32, i32) {
    %c0_i32 = arith.constant 0 : i32
    %c0_i32_0 = arith.constant 0 : i32
    %c0_i32_1 = arith.constant 0 : i32
    return %c0_i32, %c0_i32_0 : i32, i32
  }
  func.func @transform_13(%arg0: i32) -> (i32, i32) {
    %c0_i32 = arith.constant 0 : i32
    %c0_i32_0 = arith.constant 0 : i32
    %c0_i32_1 = arith.constant 0 : i32
    return %c0_i32, %c0_i32_0 : i32, i32
  }
  func.func @transform_14(%arg0: i32) -> (i32, i32) {
    %c0_i32 = arith.constant 0 : i32
    %c0_i32_0 = arith.constant 0 : i32
    %c0_i32_1 = arith.constant 0 : i32
    return %c0_i32, %c0_i32_0 : i32, i32
  }
  func.func @transform_15(%arg0: i32) -> (i32, i32) {
    %c0_i32 = arith.constant 0 : i32
    %c0_i32_0 = arith.constant 0 : i32
    %c0_i32_1 = arith.constant 0 : i32
    return %c0_i32, %c0_i32_0 : i32, i32
  }
  func.func @transform_16(%arg0: i32) -> (i32, i32) {
    %c0_i32 = arith.constant 0 : i32
    %c0_i32_0 = arith.constant 0 : i32
    %c0_i32_1 = arith.constant 0 : i32
    return %c0_i32, %c0_i32_0 : i32, i32
  }
  func.func @transform_17(%arg0: i32) -> (i32, i32) {
    %c0_i32 = arith.constant 0 : i32
    %c0_i32_0 = arith.constant 0 : i32
    %c0_i32_1 = arith.constant 0 : i32
    return %c0_i32, %c0_i32_0 : i32, i32
  }
  func.func @transform_18(%arg0: i32) -> (i32, i32) {
    %c0_i32 = arith.constant 0 : i32
    %c0_i32_0 = arith.constant 0 : i32
    %c0_i32_1 = arith.constant 0 : i32
    return %c0_i32, %c0_i32_0 : i32, i32
  }
  func.func @transform_19(%arg0: i32) -> (i32, i32) {
    %c0_i32 = arith.constant 0 : i32
    %c0_i32_0 = arith.constant 0 : i32
    %c0_i32_1 = arith.constant 0 : i32
    return %c0_i32, %c0_i32_0 : i32, i32
  }
  func.func @transform_20(%arg0: i32) -> (i32, i32) {
    %c0_i32 = arith.constant 0 : i32
    %c0_i32_0 = arith.constant 0 : i32
    %c0_i32_1 = arith.constant 0 : i32
    return %c0_i32, %c0_i32_0 : i32, i32
  }
  func.func @transform_21(%arg0: i32) -> (i32, i32) {
    %c0_i32 = arith.constant 0 : i32
    %c0_i32_0 = arith.constant 0 : i32
    %c0_i32_1 = arith.constant 0 : i32
    return %c0_i32, %c0_i32_0 : i32, i32
  }
  func.func @transform_22(%arg0: i32) -> (i32, i32, i32) {
    %c0_i32 = arith.constant 0 : i32
    %c0_i32_0 = arith.constant 0 : i32
    %c0_i32_1 = arith.constant 0 : i32
    %c0_i32_2 = arith.constant 0 : i32
    return %c0_i32, %c0_i32_0, %c0_i32_1 : i32, i32, i32
  }
  func.func @transform_23(%arg0: i32) -> (i32, i32, i32) {
    %c0_i32 = arith.constant 0 : i32
    %c0_i32_0 = arith.constant 0 : i32
    %c0_i32_1 = arith.constant 0 : i32
    %c0_i32_2 = arith.constant 0 : i32
    return %c0_i32, %c0_i32_0, %c0_i32_1 : i32, i32, i32
  }
  func.func @transform_24(%arg0: i32) -> (i32, i32, i32) {
    %c0_i32 = arith.constant 0 : i32
    %c0_i32_0 = arith.constant 0 : i32
    %c0_i32_1 = arith.constant 0 : i32
    %c0_i32_2 = arith.constant 0 : i32
    return %c0_i32, %c0_i32_0, %c0_i32_1 : i32, i32, i32
  }
  func.func @transform_25(%arg0: i32) -> (i32, i32) {
    %c0_i32 = arith.constant 0 : i32
    %c0_i32_0 = arith.constant 0 : i32
    %c0_i32_1 = arith.constant 0 : i32
    return %c0_i32, %c0_i32_0 : i32, i32
  }
  func.func @transform_26(%arg0: i32) -> (i32, i32) {
    %c0_i32 = arith.constant 0 : i32
    %c0_i32_0 = arith.constant 0 : i32
    %c0_i32_1 = arith.constant 0 : i32
    return %c0_i32, %c0_i32_0 : i32, i32
  }
  func.func @transform_27(%arg0: i32) -> (i32, i32) {
    %c0_i32 = arith.constant 0 : i32
    %c0_i32_0 = arith.constant 0 : i32
    %c0_i32_1 = arith.constant 0 : i32
    return %c0_i32, %c0_i32_0 : i32, i32
  }
  func.func @transform_28(%arg0: i32) -> (i32, i32) {
    %c0_i32 = arith.constant 0 : i32
    %c0_i32_0 = arith.constant 0 : i32
    %c0_i32_1 = arith.constant 0 : i32
    return %c0_i32, %c0_i32_0 : i32, i32
  }
  func.func @transform_29(%arg0: i32) -> (i32, i32) {
    %c0_i32 = arith.constant 0 : i32
    %c0_i32_0 = arith.constant 0 : i32
    %c0_i32_1 = arith.constant 0 : i32
    return %c0_i32, %c0_i32_0 : i32, i32
  }
  func.func @transform_30(%arg0: i32) -> (i32, i32) {
    %c0_i32 = arith.constant 0 : i32
    %c0_i32_0 = arith.constant 0 : i32
    %c0_i32_1 = arith.constant 0 : i32
    return %c0_i32, %c0_i32_0 : i32, i32
  }
  func.func @transform_31(%arg0: i32) -> (i32, i32) {
    %c0_i32 = arith.constant 0 : i32
    %c0_i32_0 = arith.constant 0 : i32
    %c0_i32_1 = arith.constant 0 : i32
    return %c0_i32, %c0_i32_0 : i32, i32
  }
  func.func @transform_32(%arg0: i32) -> (i32, i32) {
    %c0_i32 = arith.constant 0 : i32
    %c0_i32_0 = arith.constant 0 : i32
    return %arg0, %c0_i32 : i32, i32
  }
}

</mosaic_0001>

<bundles_post_ra>
// kernel: nasrwb_forward.1
= control target key start
LH: loop header
LB: loop body
LE: loop exit
PB: predicated region body
PF: predicated region fallthrough
CT: control target
= control target key end

     0   :  { %v3294_v0 = vmov 0.0|0.0   ;;  %s3295_s3 = smov 6   ;;  %vm3296_vm0 = vmmov 0   ;;  %v3297_v1 = vmov 0.0   ;;  %v3298_v2 = vmov 0   ;;  %s3300_s10 = smov 14   ;;  %s3869_s0 = inlined_call_operand.smem [shape: u32[33], index: -1, kind: input, shape index: {}] }
   0x1   :  { %2883 = vmatprep.subr.bf16.mxu0 %v3294_v0  ;;  %s3342_s6 = sld [smem:[%s3869_s0 + %s3295_s3]]   ;;  %2576 = vmatprep.mubr.msk.f32.mxu0 %vm3296_vm0, %v3297_v1  ;;  %v3299_v3 = vmov 2   ;;  %v3301_v22 = vmov 1   ;;  %v3302_v23 = vmov 3   ;;  %s3303_s14 = smov 8   ;;  %vm475_vm1 = vcmask 588800  }
   0x2   :  { %3284 = vset.pattern.permute.xlu0 %v3298_v2  ;;  %3286 = vset.pattern.permute.xlu1 %v3299_v3  ;;  %s1_s9 = sld [smem:[%s3869_s0]]   ;;  %s3304_s18 = smov 2   ;;  %vm394_vm2 = vcmask 261120   ;;  %vm556_vm3 = vcmask 195584   ;;  %vm717_vm4 = vcmask 130048   ;;  %vm902_vm5 = vcmask 523264  }
   0x3   :  { %2907 = vmatprep.subr.bf16.mxu1 %v3294_v0  ;;  %2587 = vmatprep.mubr.msk.f32.mxu1 %vm3296_vm0, %v3297_v1  ;;  %s3359_s13 = sld [smem:[%s3869_s0 + %s3300_s10]]   ;;  %s3305_s22 = smov 3   ;;  %vm2113_vm6 = vcmask 7168  }
   0x4   :  { %s3382_s17 = sld [smem:[%s3869_s0 + %s3303_s14]]   ;;  %s3306_s26 = smov 18  }
   0x5   :  { %s2120_s21 = sld [smem:[%s3869_s0 + %s3304_s18]]   ;;  %s3307_s30 = smov 1  }
   0x6   :  { %s2121_s25 = sld [smem:[%s3869_s0 + %s3305_s22]]   ;;  %s3308_s4 = smov 4  }
   0x7   :  { %v142_v4 = vld [vmem:[%s3342_s6] sm:$0xff]  ;;  %v143_v5 = vld [vmem:[%s3342_s6 + $0x8] sm:$0xff]  ;;  %v144_v6 = vld [vmem:[%s3342_s6 + $0x10] sm:$0xff]  ;;  %s2136_s29 = sld [smem:[%s3869_s0 + %s3306_s26]]   ;;  %s3309_s8 = smov 7  }
   0x8   :  { %v2884_v7 = vpack.c.bf16 %v143_v5, %v142_v4  ;;  %v145_v8 = vld [vmem:[%s3342_s6 + $0x18] sm:$0xff]  ;;  %v146_v10 = vld [vmem:[%s3342_s6 + $0x20] sm:$0xff]  ;;  %v147_v11 = vld [vmem:[%s3342_s6 + $0x28] sm:$0xff]  ;;  %s2119_s3 = sld [smem:[%s3869_s0 + %s3307_s30]]   ;;  %s3310_s12 = smov 16  }
   0x9   :  { %v2887_v9 = vpack.c.bf16 %v145_v8, %v144_v6  ;;  %v2890_v12 = vpack.c.bf16 %v147_v11, %v146_v10  ;;  %v148_v13 = vld [vmem:[%s3342_s6 + $0x30] sm:$0xff]  ;;  %v149_v14 = vld [vmem:[%s3342_s6 + $0x38] sm:$0xff]  ;;  %v136_v15 = vld [vmem:[%s1_s9] sm:$0xff]  ;;  %s2122_s7 = sld [smem:[%s3869_s0 + %s3308_s4]]   ;;  %s3311_s16 = smov 9  }
   0xa   :  { %2885 = vmatpush3.bf16.msra.mxu0 %v2884_v7  ;;  %v173_v16 = vld [vmem:[%s3359_s13] sm:$0xff]  ;;  %v174_v17 = vld [vmem:[%s3359_s13 + $0x8] sm:$0xff]  ;;  %245 = vperm.xlu0 %3284, %v136_v15   ;;  %v2893_v19 = vpack.c.bf16 %v149_v14, %v148_v13  ;;  %v152_v25 = vld [vmem:[%s3342_s6 + $0x50] sm:$0xff]  ;;  %s2125_s11 = sld [smem:[%s3869_s0 + %s3309_s8]]   ;;  %s3312_s20 = smov 20  }
   0xb   :  { %2886 = vmatprep.subr.bf16.mxu0 %v3294_v0  ;;  %271 = vperm.xlu1 %3286, %v136_v15   ;;  %v2908_v18 = vpack.c.bf16 %v174_v17, %v173_v16  ;;  %v150_v20 = vld [vmem:[%s3342_s6 + $0x40] sm:$0xff]  ;;  %v151_v21 = vld [vmem:[%s3342_s6 + $0x48] sm:$0xff]  ;;  %v153_v26 = vld [vmem:[%s3342_s6 + $0x58] sm:$0xff]  ;;  %s2134_s15 = sld [smem:[%s3869_s0 + %s3310_s12]]   ;;  %s3313_s24 = smov 22   ;;  %v248_v17 = vlaneseq }
   0xc   :  { %v2896_v24 = vpack.c.bf16 %v151_v21, %v150_v20  ;;  %v2899_v27 = vpack.c.bf16 %v153_v26, %v152_v25  ;;  %v154_v28 = vld [vmem:[%s3342_s6 + $0x60] sm:$0xff]  ;;  %v155_v29 = vld [vmem:[%s3342_s6 + $0x68] sm:$0xff]  ;;  %v156_v31 = vld [vmem:[%s3342_s6 + $0x70] sm:$0xff]  ;;  %s2127_s19 = sld [smem:[%s3869_s0 + %s3311_s16]]   ;;  %s3314_s28 = smov 5  }
   0xd   :  { %2909 = vmatpush3.bf16.msra.mxu1 %v2908_v18  ;;  %v2902_v30 = vpack.c.bf16 %v155_v29, %v154_v28  ;;  %v157_v32 = vld [vmem:[%s3342_s6 + $0x78] sm:$0xff]  ;;  %v159_v34 = vld [vmem:[%s3382_s17] sm:$0xff]  ;;  %v160_v35 = vld [vmem:[%s3382_s17 + $0x8] sm:$0xff]  ;;  %s2138_s23 = sld [smem:[%s3869_s0 + %s3312_s20]]   ;;  %s3315_s2 = smov 10  }
   0xe   :  { %2888 = vmatpush3.bf16.msra.mxu0 %v2887_v9  ;;  %2910 = vmatprep.subr.bf16.mxu1 %v3294_v0  ;;  %v2905_v33 = vpack.c.bf16 %v157_v32, %v156_v31  ;;  %v138_v36 = vld [vmem:[%s2120_s21] sm:$0xff]  ;;  %v2914_v37 = vpack.c.bf16 %v160_v35, %v159_v34  ;;  %v161_v38 = vld [vmem:[%s3382_s17 + $0x10] sm:$0xff]  ;;  %v162_v39 = vld [vmem:[%s3382_s17 + $0x18] sm:$0xff]  ;;  %s3446_s27 = sld [smem:[%s3869_s0 + %s3313_s24]]   ;;  %s3316_s6 = smov 11  }
   0xf   :  { %2889 = vmatprep.subr.bf16.mxu0 %v3294_v0  ;;  %3285 = vset.pattern.permute.xlu0 %v3301_v22  ;;  %v2917_v40 = vpack.c.bf16 %v162_v39, %v161_v38  ;;  %v163_v41 = vld [vmem:[%s3382_s17 + $0x20] sm:$0xff]  ;;  %v164_v42 = vld [vmem:[%s3382_s17 + $0x28] sm:$0xff]  ;;  %v165_v44 = vld [vmem:[%s3382_s17 + $0x30] sm:$0xff]  ;;  %s2123_s1 = sld [smem:[%s3869_s0 + %s3314_s28]]   ;;  %v3461_v22 = vshrl.u32 %v248_v17, 7  ;;  %s3317_s10 = smov 24  }
  0x10   :  { %3287 = vset.pattern.permute.xlu1 %v3302_v23  ;;  %261 = vperm.xlu0 %3285, %v136_v15   ;;  %v2920_v43 = vpack.c.bf16 %v164_v42, %v163_v41  ;;  %v166_v45 = vld [vmem:[%s3382_s17 + $0x38] sm:$0xff]  ;;  %v167_v47 = vld [vmem:[%s3382_s17 + $0x40] sm:$0xff]  ;;  %v175_v49 = vld [vmem:[%s3359_s13 + $0x10] sm:$0xff]  ;;  %s2128_s5 = sld [smem:[%s3869_s0 + %s3315_s2]]   ;;  %s3318_s14 = smov 15  }
  0x11   :  { %281 = vperm.xlu1 %3287, %v136_v15   ;;  %v2923_v46 = vpack.c.bf16 %v166_v45, %v165_v44  ;;  %v139_v48 = vld [vmem:[%s2121_s25] sm:$0xff]  ;;  %v176_v50 = vld [vmem:[%s3359_s13 + $0x18] sm:$0xff]  ;;  %v183_v53 = vld [vmem:[%s2136_s29 + $0x8] sm:$0xff]  ;;  %v250_v26 = vsub.s32 0, %v3461_v22  ;;  %s2129_s9 = sld [smem:[%s3869_s0 + %s3316_s6]]   ;;  %v276_v38 = vsub.s32 2, %v3461_v22  ;;  %s3319_s18 = smov 17  }
  0x12   :  { %2891 = vmatpush3.bf16.msra.mxu0 %v2890_v12  ;;  %v2911_v51 = vpack.c.bf16 %v176_v50, %v175_v49  ;;  %v182_v52 = vld [vmem:[%s2136_s29] sm:$0xff]  ;;  %v184_v54 = vld [vmem:[%s2136_s29 + $0x10] sm:$0xff]  ;;  %v185_v56 = vld [vmem:[%s2136_s29 + $0x18] sm:$0xff]  ;;  %v286_v49 = vsub.s32 3, %v3461_v22  ;;  %s3525_s13 = sld [smem:[%s3869_s0 + %s3317_s10]]   ;;  %s3320_s22 = smov 23  }
  0x13   :  { %2892 = vmatprep.subr.bf16.mxu0 %v3294_v0  ;;  %v2929_v55 = vpack.c.bf16 %v183_v53, %v182_v52  ;;  %v137_v57 = vld [vmem:[%s2119_s3] sm:$0xff]  ;;  %v2932_v58 = vpack.c.bf16 %v185_v56, %v184_v54  ;;  %v179_v62 = vld [vmem:[%s2134_s15 + $0x8] sm:$0xff]  ;;  %v180_v6 = vld [vmem:[%s2134_s15 + $0x10] sm:$0xff]  ;;  %s2133_s17 = sld [smem:[%s3869_s0 + %s3318_s14]]   ;;  %s3321_s26 = smov 19  }
  0x14   :  { %3289 = vset.pattern.permute.xlu0 %v3298_v2  ;;  %2912 = vmatpush3.bf16.msra.mxu1 %v2911_v51  ;;  %v140_v59 = vld [vmem:[%s2122_s7] sm:$0xff]  ;;  %v188_v9 = vld [vmem:[%s2138_s23 + $0x8] sm:$0xff]  ;;  %v794_v20 = vld [vmem:[%s3446_s27 + $0x10] sm:$0xff]  ;;  %s2135_s21 = sld [smem:[%s3869_s0 + %s3319_s18]]   ;;  %s3327_s20 = smov 28  }
  0x15   :  { %3288 = vset.pattern.permute.xlu1 %v3298_v2  ;;  %2925 = vmatprep.subr.bf16.mxu1 %v3294_v0  ;;  %v2154_v60 = vld [vmem:[%s2125_s11] ss:$0 sm:$0xff]  ;;  %v793_v16 = vld [vmem:[%s3446_s27 + $0x8] sm:$0xff]  ;;  %v795_v21 = vld [vmem:[%s3446_s27 + $0x18] sm:$0xff]  ;;  %s3595_s25 = sld [smem:[%s3869_s0 + %s3320_s22]]   ;;  %s3328_s24 = smov 27  }
  0x16   :  { %2894 = vmatpush3.bf16.msra.mxu0 %v2893_v19  ;;  %293 = vperm.xlu1 %3288, %v137_v57   ;;  %v178_v61 = vld [vmem:[%s2134_s15] sm:$0xff]  ;;  %v2941_v23 = vpack.c.bf16 %v795_v21, %v794_v20  ;;  %v797_v25 = vld [vmem:[%s3446_s27 + $0x28] sm:$0xff]  ;;  %v799_v31 = vld [vmem:[%s3446_s27 + $0x38] sm:$0xff]  ;;  %s2137_s30 = sld [smem:[%s3869_s0 + %s3321_s26]]   ;;  %s3329_s29 = smov 31  }
  0x17   :  { %2895 = vmatprep.subr.bf16.mxu0 %v3294_v0  ;;  %v2926_v4 = vpack.c.bf16 %v179_v62, %v178_v61  ;;  %v2157_v7 = vld [vmem:[%s2127_s19] ss:$0 sm:$0xff]  ;;  %v807_v61 = vld [vmem:[%s3446_s27 + $0x78] sm:$0xff]  ;;  %s2145_s28 = sld [smem:[%s3869_s0 + %s3328_s24]]   ;;  %s3330_s3 = smov 29  }
  0x18   :  { %v187_v8 = vld [vmem:[%s2138_s23] sm:$0xff]  ;;  %s3822_s23 = sld [smem:[%s3869_s0 + %s3327_s20]]   ;;  %s3331_s7 = smov 30  }
  0x19   :  { %v2935_v13 = vpack.c.bf16 %v188_v9, %v187_v8  ;;  %v792_v15 = vld [vmem:[%s3446_s27] sm:$0xff]  ;;  %s2149_s2 = sld [smem:[%s3869_s0 + %s3329_s29]]   ;;  %s3332_s11 = smov 32  }
  0x1a   :  { %2897 = vmatpush3.bf16.msra.mxu0 %v2896_v24  ;;  %v141_v18 = vld [vmem:[%s2123_s1] sm:$0xff]  ;;  %v2938_v19 = vpack.c.bf16 %v793_v16, %v792_v15  ;;  %v2211_v16 = vld [vmem:[%s3446_s27 + $0x148] sm:$0xff]  ;;  %s3322_s1 = smov 12   ;;  %s2147_s6 = sld [smem:[%s3869_s0 + %s3330_s3]]  }
  0x1b   :  { %2898 = vmatprep.subr.bf16.mxu0 %v3294_v0  ;;  %v796_v24 = vld [vmem:[%s3446_s27 + $0x20] sm:$0xff]  ;;  %s2130_s4 = sld [smem:[%s3869_s0 + %s3322_s1]]  }
  0x1c   :  { %v2944_v28 = vpack.c.bf16 %v797_v25, %v796_v24  ;;  %v804_v54 = vld [vmem:[%s3446_s27 + $0x60] sm:$0xff]  ;;  %v2216_v25 = vld [vmem:[%s3446_s27 + $0x170] sm:$0xff]  ;;  %s2148_s10 = sld [smem:[%s3869_s0 + %s3331_s7]]  }
  0x1d   :  { %v2206_v9 = vld [vmem:[%s3446_s27 + $0x120] sm:$0xff]  ;;  %s2150_s14 = sld [smem:[%s3869_s0 + %s3332_s11]]  }
  0x1e   :  { %2900 = vmatpush3.bf16.msra.mxu0 %v2899_v27  ;;  %v169_v27 = vld [vmem:[%s2128_s5] sm:$0xf]  ;;  %s3323_s5 = smov 13  }
  0x1f   :  { %2901 = vmatprep.subr.bf16.mxu0 %v3294_v0  ;;  %v251_v32 = vrot.slane %v169_v27, %v250_v26  ;;  %v277_v45 = vrot.slane %v169_v27, %v276_v38  ;;  %v287_v53 = vrot.slane %v169_v27, %v286_v49  ;;  %v2210_v15 = vld [vmem:[%s3446_s27 + $0x140] sm:$0xff]  ;;  %v901_v49 = vld [vmem:[%s3525_s13 + $0x78] sm:$0xff]  ;;  %s2131_s8 = sld [smem:[%s3869_s0 + %s3323_s5]]  }
  0x20   :  { %v3030_v17 = vpack.c.bf16 %v2211_v16, %v2210_v15  ;;  %v2214_v21 = vld [vmem:[%s3446_s27 + $0x160] sm:$0xff]  ;;  %v2247_v16 = vld [vmem:[%s3446_s27 + $0x1d0] sm:$0xff] }
  0x22   :  { %2903 = vmatpush3.bf16.msra.mxu0 %v2902_v30  ;;  %v798_v30 = vld [vmem:[%s3446_s27 + $0x30] sm:$0xff] }
  0x23   :  { %2904 = vmatprep.subr.bf16.mxu0 %v3294_v0  ;;  %v2947_v34 = vpack.c.bf16 %v799_v31, %v798_v30  ;;  %v889_v30 = vld [vmem:[%s3525_s13 + $0x18] sm:$0xff]  ;;  %v886_v31 = vld [vmem:[%s3525_s13] sm:$0xff] }
  0x26   :  { %2906 = vmatpush3.bf16.msra.mxu0 %v2905_v33  ;;  %v266_v33 = vsub.s32 1, %v3461_v22 }
  0x27   :  { %2913 = vmatprep.subr.bf16.mxu0 %v3294_v0 }
  0x28   :  { %v267_v39 = vrot.slane %v169_v27, %v266_v33  ;;  %v2217_v27 = vld [vmem:[%s3446_s27 + $0x178] sm:$0xff] }
  0x29   :  { %2577 = vmatmul.mubr.f32.vlgmr.msra.gmra.mrb[0].mxu0 %v138_v36  ;;  %v800_v36 = vld [vmem:[%s3446_s27 + $0x40] sm:$0xff] }
  0x2a   :  { %2915 = vmatpush3.bf16.msra.mxu0 %v2914_v37  ;;  %2608 = vmatprep.mubr.msk.f32.mxu0 %vm3296_vm0, %v3297_v1  ;;  %v801_v37 = vld [vmem:[%s3446_s27 + $0x48] sm:$0xff] }
  0x2b   :  { %2916 = vmatprep.subr.bf16.mxu0 %v3294_v0  ;;  %v2950_v42 = vpack.c.bf16 %v801_v37, %v800_v36  ;;  %v893_v36 = vld [vmem:[%s3525_s13 + $0x38] sm:$0xff] }
  0x2e   :  { %2918 = vmatpush3.bf16.msra.mxu0 %v2917_v40  ;;  %v2151_v40 = vld [vmem:[%s2129_s9] ss:$0 sm:$0xff]  ;;  %s3324_s9 = smov 21  }
  0x2f   :  { %2919 = vmatprep.subr.bf16.mxu0 %v3294_v0  ;;  %s2139_s12 = sld [smem:[%s3869_s0 + %s3324_s9]]  }
  0x32   :  { %2921 = vmatpush3.bf16.msra.mxu0 %v2920_v43 }
  0x33   :  { %2922 = vmatprep.subr.bf16.mxu0 %v3294_v0 }
  0x36   :  { %2924 = vmatpush3.bf16.msra.mxu0 %v2923_v46 }
  0x37   :  { %2606 = vmatprep.subr.mxu0 %v3297_v1 }
  0x3a   :  { %2607 = vmatpush3.msra.mxu0 %v167_v47  ;;  %v802_v47 = vld [vmem:[%s3446_s27 + $0x50] sm:$0xff] }
  0x3b   :  { %2609 = vmatmul.mubr.msk.f32.vlgmr.msra.gmra.mrb[2].mxu0 %vm475_vm1, %v139_v48  ;;  %2928 = vmatprep.subr.bf16.mxu0 %v3294_v0  ;;  %v803_v48 = vld [vmem:[%s3446_s27 + $0x58] sm:$0xff] }
  0x3c   :  { %2628 = vmatprep.mubr.msk.f32.mxu0 %vm3296_vm0, %v3297_v1  ;;  %2930 = vmatpush3.bf16.msra.mxu0 %v2929_v55  ;;  %v2953_v50 = vpack.c.bf16 %v803_v48, %v802_v47  ;;  %v805_v55 = vld [vmem:[%s3446_s27 + $0x68] sm:$0xff] }
  0x3d   :  { %2931 = vmatprep.subr.bf16.mxu0 %v3294_v0  ;;  %v2956_v57 = vpack.c.bf16 %v805_v55, %v804_v54  ;;  %v899_v48 = vld [vmem:[%s3525_s13 + $0x68] sm:$0xff] }
  0x40   :  { %2933 = vmatpush3.bf16.msra.mxu0 %v2932_v58 }
  0x43   :  { %2629 = vmatmul.mubr.msk.f32.vlgmr.msra.gmra.mrb[4].mxu0 %vm394_vm2, %v140_v59 }
  0x44   :  { %970 = vmatprep.mubr.f32.mxu0 %v3297_v1 }
  0x89   :  { %v246_v29 = vpop.permute.xlu0 %245 }
  0x8a   :  { %v252_v35 = vmul.f32 %v251_v32, %v246_v29  ;;  %v272_v43 = vpop.permute.xlu1 %271  ;;  %v887_v29 = vld [vmem:[%s3525_s13 + $0x8] sm:$0xff] }
  0x8b   :  { %v278_v51 = vmul.f32 %v277_v45, %v272_v43  ;;  %v2961_v32 = vpack.c.bf16 %v889_v30, %v887_v29  ;;  %v894_v45 = vld [vmem:[%s3525_s13 + $0x40] sm:$0xff] }
  0x8c   :  { %v259_v44 = vadd.f32 %v2151_v40, %v252_v35  ;;  %v891_v35 = vld [vmem:[%s3525_s13 + $0x28] sm:$0xff]  ;;  %v892_v40 = vld [vmem:[%s3525_s13 + $0x30] sm:$0xff] }
  0x8d   :  { %v2965_v38 = vpack.c.bf16 %v893_v36, %v891_v35  ;;  %2962 = vmatprep.subr.bf16.mxu0 %v2961_v32  ;;  %v2273_v32 = vld [vmem:[%s3446_s27 + $0x208] sm:$0xff]  ;;  %v2274_v36 = vld [vmem:[%s3446_s27 + $0x210] sm:$0xff] }
  0x8f   :  { %v262_v41 = vpop.permute.xlu0 %261 }
  0x90   :  { %v268_v46 = vmul.f32 %v267_v39, %v262_v41  ;;  %v282_v56 = vpop.permute.xlu1 %281  ;;  %v890_v39 = vld [vmem:[%s3525_s13 + $0x20] sm:$0xff]  ;;  %v895_v41 = vld [vmem:[%s3525_s13 + $0x48] sm:$0xff] }
  0x91   :  { %v288_v59 = vmul.f32 %v287_v53, %v282_v56  ;;  %v2967_v43 = vpack.c.bf16 %v892_v40, %v890_v39  ;;  %v2155_v56 = vld [vmem:[%s2133_s17] ss:$0 sm:$0xff]  ;;  %v2277_v40 = vld [vmem:[%s3446_s27 + $0x228] sm:$0xff] }
  0x92   :  { %v269_v52 = vadd.f32 %v268_v46, %v259_v44  ;;  %v896_v46 = vld [vmem:[%s3525_s13 + $0x50] sm:$0xff]  ;;  %v2276_v39 = vld [vmem:[%s3446_s27 + $0x220] sm:$0xff] }
  0x93   :  { %v2971_v47 = vpack.c.bf16 %v896_v46, %v894_v45  ;;  %v2280_v45 = vld [vmem:[%s3446_s27 + $0x240] sm:$0xff]  ;;  %v2281_v46 = vld [vmem:[%s3446_s27 + $0x248] sm:$0xff] }
  0x94   :  { %v279_v58 = vadd.f32 %v278_v51, %v269_v52  ;;  %v898_v51 = vld [vmem:[%s3525_s13 + $0x60] sm:$0xff]  ;;  %v900_v52 = vld [vmem:[%s3525_s13 + $0x70] sm:$0xff] }
  0x95   :  { %v2975_v53 = vpack.c.bf16 %v900_v52, %v898_v51  ;;  %v2167_v51 = vld [vmem:[%s3446_s27 + $0x80] sm:$0xff]  ;;  %v2168_v52 = vld [vmem:[%s3446_s27 + $0x88] sm:$0xff] }
  0xfc   :  { %v383_v63 = vpop.f32.mrb[0].mxu0 }
  0xfd   :  { %v384_v2 = vadd.f32 %v2154_v60, %v383_v63  ;;  %v2578_v3 = vpop.f32.mrb[1].mxu0  ;;  %v806_v60 = vld [vmem:[%s3446_s27 + $0x70] sm:$0xff]  ;;  %v289_v63 = vadd.f32 %v288_v59, %v279_v58  ;;  %v2238_v58 = vld [vmem:[%s3446_s27 + $0x188] sm:$0xff] }
  0xfe   :  { %v2959_v62 = vpack.c.bf16 %v807_v61, %v806_v60  ;;  %v2203_v3 = vld [vmem:[%s3446_s27 + $0x108] sm:$0xff] }
  0xff   :  { %v387_v5 = vmax.f32 %v384_v2, 0.0  ;;  %v2202_v2 = vld [vmem:[%s3446_s27 + $0x100] sm:$0xff] }
 0x101   :  { %2588 = vmatmul.mubr.msk.f32.vlgmr.msra.gmra.mrb[0].mxu1 %vm394_vm2, %v387_v5  ;;  %v290_v5 = vmax.f32 %v289_v63, 0.0 }
 0x102   :  { %2927 = vmatpush3.bf16.msra.mxu1 %v2926_v4  ;;  %2617 = vmatprep.mubr.msk.f32.mxu1 %vm3296_vm0, %v3297_v1  ;;  %v3018_v4 = vpack.c.bf16 %v2203_v3, %v2202_v2  ;;  %v2239_v2 = vld [vmem:[%s3446_s27 + $0x190] sm:$0xff]  ;;  %v2240_v3 = vld [vmem:[%s3446_s27 + $0x198] sm:$0xff] }
 0x103   :  { %2615 = vmatprep.subr.mxu1 %v3297_v1 }
 0x106   :  { %2616 = vmatpush3.msra.mxu1 %v180_v6  ;;  %v2204_v6 = vld [vmem:[%s3446_s27 + $0x110] sm:$0xff] }
 0x107   :  { %2934 = vmatprep.subr.bf16.mxu1 %v3294_v0 }
 0x10e   :  { %v545_v10 = vpop.f32.mrb[2].mxu0 }
 0x10f   :  { %v546_v11 = vadd.f32 %v2157_v7, %v545_v10  ;;  %v2610_v12 = vpop.f32.mrb[3].mxu0  ;;  %v2205_v7 = vld [vmem:[%s3446_s27 + $0x118] sm:$0xff]  ;;  %v2207_v10 = vld [vmem:[%s3446_s27 + $0x128] sm:$0xff] }
 0x110   :  { %v3021_v8 = vpack.c.bf16 %v2205_v7, %v2204_v6  ;;  %v2208_v12 = vld [vmem:[%s3446_s27 + $0x130] sm:$0xff]  ;;  %v2242_v6 = vld [vmem:[%s3446_s27 + $0x1a8] sm:$0xff] }
 0x111   :  { %v549_v14 = vmax.f32 %v546_v11, 0.0  ;;  %v3024_v11 = vpack.c.bf16 %v2207_v10, %v2206_v9  ;;  %v2244_v9 = vld [vmem:[%s3446_s27 + $0x1b8] sm:$0xff] }
 0x113   :  { %2618 = vmatmul.mubr.msk.f32.vlgmr.msra.gmra.mrb[2].mxu1 %vm556_vm3, %v549_v14 }
 0x114   :  { %2936 = vmatpush3.bf16.msra.mxu1 %v2935_v13  ;;  %2635 = vmatprep.mubr.msk.f32.mxu1 %vm3296_vm0, %v3297_v1  ;;  %v2209_v13 = vld [vmem:[%s3446_s27 + $0x138] sm:$0xff] }
 0x115   :  { %2937 = vmatprep.subr.bf16.mxu1 %v3294_v0  ;;  %v3027_v14 = vpack.c.bf16 %v2209_v13, %v2208_v12  ;;  %v2246_v12 = vld [vmem:[%s3446_s27 + $0x1c8] sm:$0xff] }
 0x116   :  { %v3544_v54 = vpop.f32.mrb[4].mxu0 }
 0x117   :  { %2636 = vmatmul.mubr.msk.f32.vlgmr.msra.gmra.mrb[4].mxu1 %vm717_vm4, %v141_v18  ;;  %v2212_v18 = vld [vmem:[%s3446_s27 + $0x150] sm:$0xff]  ;;  %v2630_v55 = vpop.f32.mrb[5].mxu0 }
 0x118   :  { %2939 = vmatpush3.bf16.msra.mxu1 %v2938_v19  ;;  %2670 = vmatprep.mubr.msk.f32.mxu1 %vm3296_vm0, %v3297_v1  ;;  %v2213_v19 = vld [vmem:[%s3446_s27 + $0x158] sm:$0xff] }
 0x119   :  { %2940 = vmatprep.subr.bf16.mxu1 %v3294_v0  ;;  %v3033_v20 = vpack.c.bf16 %v2213_v19, %v2212_v18 }
 0x11c   :  { %2942 = vmatpush3.bf16.msra.mxu1 %v2941_v23  ;;  %v2215_v23 = vld [vmem:[%s3446_s27 + $0x168] sm:$0xff] }
 0x11d   :  { %2943 = vmatprep.subr.bf16.mxu1 %v3294_v0  ;;  %v3036_v24 = vpack.c.bf16 %v2215_v23, %v2214_v21  ;;  %v2249_v21 = vld [vmem:[%s3446_s27 + $0x1e0] sm:$0xff]  ;;  %v2250_v23 = vld [vmem:[%s3446_s27 + $0x1e8] sm:$0xff] }
 0x120   :  { %2945 = vmatpush3.bf16.msra.mxu1 %v2944_v28  ;;  %v3039_v28 = vpack.c.bf16 %v2217_v27, %v2216_v25  ;;  %v2251_v25 = vld [vmem:[%s3446_s27 + $0x1f0] sm:$0xff]  ;;  %v2252_v27 = vld [vmem:[%s3446_s27 + $0x1f8] sm:$0xff] }
 0x121   :  { %2946 = vmatprep.subr.bf16.mxu1 %v3294_v0  ;;  %v3079_v29 = vpack.c.bf16 %v2252_v27, %v2251_v25  ;;  %v2179_v25 = vld [vmem:[%s3446_s27 + $0xe0] sm:$0xff]  ;;  %v2180_v27 = vld [vmem:[%s3446_s27 + $0xe8] sm:$0xff] }
 0x124   :  { %2948 = vmatpush3.bf16.msra.mxu1 %v2947_v34  ;;  %v888_v34 = vld [vmem:[%s3525_s13 + $0x10] sm:$0xff] }
 0x125   :  { %2949 = vmatprep.subr.bf16.mxu1 %v3294_v0  ;;  %v2963_v37 = vpack.c.bf16 %v888_v34, %v886_v31  ;;  %v2272_v31 = vld [vmem:[%s3446_s27 + $0x200] sm:$0xff] }
 0x126   :  { %v3098_v34 = vpack.c.bf16 %v2273_v32, %v2272_v31  ;;  %v2181_v31 = vld [vmem:[%s3446_s27 + $0xf0] sm:$0xff]  ;;  %v2182_v32 = vld [vmem:[%s3446_s27 + $0xf8] sm:$0xff] }
 0x127   :  { %2964 = vmatpush1.bf16.msra.mxu0 %v2963_v37  ;;  %v2275_v37 = vld [vmem:[%s3446_s27 + $0x218] sm:$0xff] }
 0x128   :  { %2951 = vmatpush3.bf16.msra.mxu1 %v2950_v42  ;;  %v897_v42 = vld [vmem:[%s3525_s13 + $0x58] sm:$0xff]  ;;  %2966 = vmatprep.subr.bf16.mxu0 %v2965_v38  ;;  %v3101_v38 = vpack.c.bf16 %v2275_v37, %v2274_v36  ;;  %v2186_v37 = vld [vmem:[%s3525_s13 + $0x88] sm:$0xff] }
 0x129   :  { %2952 = vmatprep.subr.bf16.mxu1 %v3294_v0  ;;  %v2969_v44 = vpack.c.bf16 %v897_v42, %v895_v41  ;;  %v3104_v41 = vpack.c.bf16 %v2277_v40, %v2276_v39  ;;  %v2278_v42 = vld [vmem:[%s3446_s27 + $0x230] sm:$0xff]  ;;  %v2185_v39 = vld [vmem:[%s3525_s13 + $0x80] sm:$0xff] }
 0x12b   :  { %2968 = vmatpush1.bf16.msra.mxu0 %v2967_v43  ;;  %v2279_v43 = vld [vmem:[%s3446_s27 + $0x238] sm:$0xff] }
 0x12c   :  { %2954 = vmatpush3.bf16.msra.mxu1 %v2953_v50  ;;  %2970 = vmatprep.subr.bf16.mxu0 %v2969_v44  ;;  %v2973_v50 = vpack.c.bf16 %v901_v49, %v899_v48  ;;  %v3107_v44 = vpack.c.bf16 %v2279_v43, %v2278_v42  ;;  %v2282_v48 = vld [vmem:[%s3446_s27 + $0x250] sm:$0xff]  ;;  %v2283_v49 = vld [vmem:[%s3446_s27 + $0x258] sm:$0xff]  ;;  %v2190_v42 = vld [vmem:[%s3525_s13 + $0xa8] sm:$0xff] }
 0x12d   :  { %2955 = vmatprep.subr.bf16.mxu1 %v3294_v0  ;;  %v3113_v55 = vpack.c.bf16 %v2283_v49, %v2282_v48  ;;  %v2192_v43 = vld [vmem:[%s3525_s13 + $0xb8] sm:$0xff]  ;;  %v2194_v48 = vld [vmem:[%s3525_s13 + $0xc8] sm:$0xff] }
 0x12e   :  { %v2196_v49 = vld [vmem:[%s3525_s13 + $0xd8] sm:$0xff] }
 0x12f   :  { %2972 = vmatpush1.bf16.msra.mxu0 %v2971_v47  ;;  %v3110_v47 = vpack.c.bf16 %v2281_v46, %v2280_v45  ;;  %v3005_v45 = vpack.c.bf16 %v2192_v43, %v2190_v42  ;;  %v2189_v46 = vld [vmem:[%s3525_s13 + $0xa0] sm:$0xff] }
 0x130   :  { %2957 = vmatpush3.bf16.msra.mxu1 %v2956_v57  ;;  %2974 = vmatprep.subr.bf16.mxu0 %v2973_v50  ;;  %v2237_v57 = vld [vmem:[%s3446_s27 + $0x180] sm:$0xff] }
 0x131   :  { %2958 = vmatprep.subr.bf16.mxu1 %v3294_v0  ;;  %v2165_v50 = vld [vmem:[%s3595_s25] ss:$0 sm:$0xff] }
 0x132   :  { %v2255_v43 = vld [vmem:[%s3525_s13 + $0x180] sm:$0xff] }
 0x133   :  { %2976 = vmatpush1.bf16.msra.mxu0 %v2975_v53 }
 0x134   :  { %2960 = vmatpush3.bf16.msra.mxu1 %v2959_v62  ;;  %2977 = vmatprep.subr.bf16.mxu0 %v3294_v0  ;;  %v3058_v62 = vpack.c.bf16 %v2238_v58, %v2237_v57  ;;  %v2284_v58 = vld [vmem:[%s3446_s27 + $0x260] sm:$0xff] }
 0x135   :  { %3017 = vmatprep.subr.bf16.mxu1 %v3294_v0 }
 0x137   :  { %2671 = vmatmul.mubr.f32.vlgmr.msra.gmra.mrb[6].mxu1 %v290_v5  ;;  %v2241_v5 = vld [vmem:[%s3446_s27 + $0x1a0] sm:$0xff] }
 0x138   :  { %3019 = vmatpush3.bf16.msra.mxu1 %v3018_v4  ;;  %2740 = vmatprep.mubr.msk.f32.mxu1 %vm3296_vm0, %v3297_v1  ;;  %v3061_v4 = vpack.c.bf16 %v2240_v3, %v2239_v2  ;;  %v3064_v7 = vpack.c.bf16 %v2242_v6, %v2241_v5  ;;  %v2161_v3 = vld [vmem:[%s2137_s30] ss:$0 sm:$0xff]  ;;  %v2287_v5 = vld [vmem:[%s3446_s27 + $0x278] sm:$0xff] }
 0x139   :  { %3020 = vmatprep.subr.bf16.mxu1 %v3294_v0 }
 0x13c   :  { %3022 = vmatpush3.bf16.msra.mxu1 %v3021_v8  ;;  %v2243_v8 = vld [vmem:[%s3446_s27 + $0x1b0] sm:$0xff] }
 0x13d   :  { %3023 = vmatprep.subr.bf16.mxu1 %v3294_v0  ;;  %v3067_v10 = vpack.c.bf16 %v2244_v9, %v2243_v8  ;;  %v2172_v8 = vld [vmem:[%s3446_s27 + $0xa8] sm:$0xff]  ;;  %v707_v9 = vadd.f32 %v2161_v3, %v3544_v54  ;;  %v2175_v54 = vld [vmem:[%s3446_s27 + $0xc0] sm:$0xff] }
 0x140   :  { %3025 = vmatpush3.bf16.msra.mxu1 %v3024_v11  ;;  %v2245_v11 = vld [vmem:[%s3446_s27 + $0x1c0] sm:$0xff] }
 0x141   :  { %3026 = vmatprep.subr.bf16.mxu1 %v3294_v0 }
 0x144   :  { %3028 = vmatpush3.bf16.msra.mxu1 %v3027_v14  ;;  %v3070_v14 = vpack.c.bf16 %v2246_v12, %v2245_v11  ;;  %v2173_v12 = vld [vmem:[%s3446_s27 + $0xb0] sm:$0xff] }
 0x145   :  { %3029 = vmatprep.subr.bf16.mxu1 %v3294_v0 }
 0x148   :  { %3031 = vmatpush3.bf16.msra.mxu1 %v3030_v17  ;;  %v2248_v17 = vld [vmem:[%s3446_s27 + $0x1d8] sm:$0xff] }
 0x149   :  { %3032 = vmatprep.subr.bf16.mxu1 %v3294_v0  ;;  %v3073_v19 = vpack.c.bf16 %v2248_v17, %v2247_v16  ;;  %v2176_v16 = vld [vmem:[%s3446_s27 + $0xc8] sm:$0xff] }
 0x14a   :  { %v2990_v17 = vpack.c.bf16 %v2176_v16, %v2175_v54 }
 0x14c   :  { %3034 = vmatpush3.bf16.msra.mxu1 %v3033_v20 }
 0x14d   :  { %3035 = vmatprep.subr.bf16.mxu1 %v3294_v0 }
 0x150   :  { %3037 = vmatpush3.bf16.msra.mxu1 %v3036_v24  ;;  %v3076_v24 = vpack.c.bf16 %v2250_v23, %v2249_v21  ;;  %v2152_v23 = vld [vmem:[%s2130_s4] ss:$0 sm:$0xff] }
 0x151   :  { %3038 = vmatprep.subr.bf16.mxu1 %v3294_v0 }
 0x154   :  { %3040 = vmatpush3.bf16.msra.mxu1 %v3039_v28  ;;  %v2159_v28 = vld [vmem:[%s2135_s21] ss:$0 sm:$0xff] }
 0x155   :  { %3057 = vmatprep.subr.bf16.mxu1 %v3294_v0 }
 0x1d4   :  { %v464_v59 = vpop.f32.mrb[0].mxu1 }
 0x1d5   :  { %v465_v60 = vadd.f32 %v2155_v56, %v464_v59  ;;  %v2589_v61 = vpop.f32.mrb[1].mxu1  ;;  %v2285_v59 = vld [vmem:[%s3446_s27 + $0x268] sm:$0xff] }
 0x1d6   :  { %v3116_v2 = vpack.c.bf16 %v2285_v59, %v2284_v58  ;;  %v2197_v59 = vld [vmem:[%s3525_s13 + $0xe0] sm:$0xff] }
 0x1d7   :  { %v468_v63 = vmax.f32 %v465_v60, 0.0  ;;  %v2978_v60 = vpack.c.bf16 %v2168_v52, %v2167_v51  ;;  %v3009_v51 = vpack.c.bf16 %v2196_v49, %v2194_v48  ;;  %v2193_v52 = vld [vmem:[%s3525_s13 + $0xc0] sm:$0xff] }
 0x1d9   :  { %2741 = vmatmul.mubr.f32.vlgmr.msra.gmra.mrb[8].mxu1 %v468_v63  ;;  %v2170_v63 = vld [vmem:[%s3446_s27 + $0x98] sm:$0xff] }
 0x1da   :  { %3059 = vmatpush3.bf16.msra.mxu1 %v3058_v62  ;;  %2775 = vmatprep.mubr.msk.f32.mxu1 %vm3296_vm0, %v3297_v1  ;;  %v2169_v62 = vld [vmem:[%s3446_s27 + $0x90] sm:$0xff] }
 0x1db   :  { %3060 = vmatprep.subr.bf16.mxu1 %v3294_v0  ;;  %v2981_v6 = vpack.c.bf16 %v2170_v63, %v2169_v62  ;;  %v2221_v62 = vld [vmem:[%s3525_s13 + $0x108] sm:$0xff]  ;;  %v2223_v63 = vld [vmem:[%s3525_s13 + $0x118] sm:$0xff] }
 0x1de   :  { %3062 = vmatpush3.bf16.msra.mxu1 %v3061_v4  ;;  %v2286_v4 = vld [vmem:[%s3446_s27 + $0x270] sm:$0xff] }
 0x1df   :  { %3063 = vmatprep.subr.bf16.mxu1 %v3294_v0 }
 0x1e2   :  { %3065 = vmatpush3.bf16.msra.mxu1 %v3064_v7  ;;  %v2171_v7 = vld [vmem:[%s3446_s27 + $0xa0] sm:$0xff] }
 0x1e3   :  { %3066 = vmatprep.subr.bf16.mxu1 %v3294_v0  ;;  %v2984_v11 = vpack.c.bf16 %v2172_v8, %v2171_v7 }
 0x1e6   :  { %3068 = vmatpush3.bf16.msra.mxu1 %v3067_v10  ;;  %v626_v13 = vpop.f32.mrb[2].mxu1  ;;  %v3119_v10 = vpack.c.bf16 %v2287_v5, %v2286_v4 }
 0x1e7   :  { %v2619_v15 = vpop.f32.mrb[3].mxu1  ;;  %3069 = vmatprep.subr.bf16.mxu1 %v3294_v0  ;;  %v627_v30 = vadd.f32 %v2159_v28, %v626_v13  ;;  %v2174_v13 = vld [vmem:[%s3446_s27 + $0xb8] sm:$0xff] }
 0x1e8   :  { %v2987_v15 = vpack.c.bf16 %v2174_v13, %v2173_v12  ;;  %v2225_v13 = vld [vmem:[%s3525_s13 + $0x128] sm:$0xff] }
 0x1e9   :  { %v630_v35 = vmax.f32 %v627_v30, 0.0  ;;  %v2996_v30 = vpack.c.bf16 %v2180_v27, %v2179_v25 }
 0x1ea   :  { %3071 = vmatpush3.bf16.msra.mxu1 %v3070_v14  ;;  %v3570_v18 = vpop.f32.mrb[4].mxu1  ;;  %v710_v14 = vmax.f32 %v707_v9, 0.0  ;;  %v2184_v9 = vld [vmem:[%s3595_s25 + $0x1] ss:$0 sm:$0xff] }
 0x1eb   :  { %v2637_v20 = vpop.f32.mrb[5].mxu1  ;;  %3072 = vmatprep.subr.bf16.mxu1 %v3294_v0 }
 0x1ec   :  { %v2178_v20 = vld [vmem:[%s3446_s27 + $0xd8] sm:$0xff] }
 0x1ee   :  { %3074 = vmatpush3.bf16.msra.mxu1 %v3073_v19  ;;  %v2177_v19 = vld [vmem:[%s3446_s27 + $0xd0] sm:$0xff] }
 0x1ef   :  { %3075 = vmatprep.subr.bf16.mxu1 %v3294_v0  ;;  %v2993_v21 = vpack.c.bf16 %v2178_v20, %v2177_v19  ;;  %v2224_v20 = vld [vmem:[%s3525_s13 + $0x120] sm:$0xff] }
 0x1f2   :  { %3077 = vmatpush3.bf16.msra.mxu1 %v3076_v24  ;;  %v294_v24 = vpop.permute.xlu1 %293 }
 0x1f3   :  { %3078 = vmatprep.subr.bf16.mxu1 %v3294_v0  ;;  %v302_v28 = vmul.f32 %v2152_v23, %v294_v24  ;;  %v2229_v23 = vld [vmem:[%s3525_s13 + $0x148] sm:$0xff]  ;;  %v2231_v24 = vld [vmem:[%s3525_s13 + $0x158] sm:$0xff] }
 0x1f4   :  { %v3049_v27 = vpack.c.bf16 %v2231_v24, %v2229_v23  ;;  %v2298_v24 = vld [vmem:[%s3525_s13 + $0x240] sm:$0xff] }
 0x1f6   :  { %3080 = vmatpush3.bf16.msra.mxu1 %v3079_v29  ;;  %v2153_v29 = vld [vmem:[%s2131_s8] ss:$0 sm:$0xff] }
 0x1f7   :  { %3097 = vmatprep.subr.bf16.mxu1 %v3294_v0 }
 0x1f9   :  { %2776 = vmatmul.mubr.f32.vlgmr.msra.gmra.mrb[10].mxu1 %v630_v35  ;;  %v2999_v35 = vpack.c.bf16 %v2182_v32, %v2181_v31  ;;  %v2235_v31 = vld [vmem:[%s3525_s13 + $0x178] sm:$0xff] }
 0x1fa   :  { %3099 = vmatpush3.bf16.msra.mxu1 %v3098_v34  ;;  %2810 = vmatprep.mubr.msk.f32.mxu1 %vm3296_vm0, %v3297_v1  ;;  %v309_v34 = vadd.f32 %v2153_v29, %v302_v28  ;;  %v2228_v28 = vld [vmem:[%s3525_s13 + $0x140] sm:$0xff]  ;;  %v2230_v29 = vld [vmem:[%s3525_s13 + $0x150] sm:$0xff] }
 0x1fb   :  { %3100 = vmatprep.subr.bf16.mxu1 %v3294_v0  ;;  %v3051_v32 = vpack.c.bf16 %v2230_v29, %v2228_v28  ;;  %v2305_v28 = vld [vmem:[%s3525_s13 + $0x278] sm:$0xff] }
 0x1fc   :  { %v310_v36 = vmax.f32 %v309_v34, 0.0 }
 0x1fe   :  { %3102 = vmatpush3.bf16.msra.mxu1 %v3101_v38  ;;  %v2188_v38 = vld [vmem:[%s3525_s13 + $0x98] sm:$0xff] }
 0x1ff   :  { %3103 = vmatprep.subr.bf16.mxu1 %v3294_v0  ;;  %v3001_v40 = vpack.c.bf16 %v2188_v38, %v2186_v37  ;;  %v2219_v37 = vld [vmem:[%s3595_s25 + $0x2] ss:$0 sm:$0xff]  ;;  %v2256_v38 = vld [vmem:[%s3525_s13 + $0x188] sm:$0xff] }
 0x202   :  { %3105 = vmatpush3.bf16.msra.mxu1 %v3104_v41  ;;  %v2187_v41 = vld [vmem:[%s3525_s13 + $0x90] sm:$0xff] }
 0x203   :  { %3106 = vmatprep.subr.bf16.mxu1 %v3294_v0 }
 0x206   :  { %3108 = vmatpush3.bf16.msra.mxu1 %v3107_v44  ;;  %v3003_v44 = vpack.c.bf16 %v2187_v41, %v2185_v39  ;;  %v2258_v39 = vld [vmem:[%s3525_s13 + $0x198] sm:$0xff] }
 0x207   :  { %3109 = vmatprep.subr.bf16.mxu1 %v3294_v0  ;;  %v3081_v42 = vpack.c.bf16 %v2258_v39, %v2256_v38  ;;  %v2308_v38 = vld [vmem:[%s3446_s27 + $0x288] sm:$0xff] }
 0x20a   :  { %v881_v53 = vpop.f32.mrb[6].mxu1  ;;  %3111 = vmatpush3.bf16.msra.mxu1 %v3110_v47  ;;  %v2191_v47 = vld [vmem:[%s3525_s13 + $0xb0] sm:$0xff] }
 0x20b   :  { %v882_v56 = vadd.f32 %v2165_v50, %v881_v53  ;;  %v2672_v57 = vpop.f32.mrb[7].mxu1  ;;  %3112 = vmatprep.subr.bf16.mxu1 %v3294_v0  ;;  %v3007_v50 = vpack.c.bf16 %v2191_v47, %v2189_v46  ;;  %v2195_v53 = vld [vmem:[%s3525_s13 + $0xd0] sm:$0xff]  ;;  %v2262_v46 = vld [vmem:[%s3525_s13 + $0x1b8] sm:$0xff] }
 0x20c   :  { %v2200_v57 = vld [vmem:[%s3525_s13 + $0xf8] sm:$0xff] }
 0x20d   :  { %v885_v61 = vmax.f32 %v882_v56, 0.0  ;;  %v2198_v56 = vld [vmem:[%s3525_s13 + $0xe8] sm:$0xff] }
 0x20e   :  { %3114 = vmatpush3.bf16.msra.mxu1 %v3113_v55  ;;  %v3011_v55 = vpack.c.bf16 %v2195_v53, %v2193_v52  ;;  %v3013_v58 = vpack.c.bf16 %v2200_v57, %v2198_v56  ;;  %v2264_v52 = vld [vmem:[%s3525_s13 + $0x1c8] sm:$0xff]  ;;  %v2266_v53 = vld [vmem:[%s3525_s13 + $0x1d8] sm:$0xff]  ;;  %v2263_v57 = vld [vmem:[%s3525_s13 + $0x1c0] sm:$0xff] }
 0x20f   :  { %2166 = vmatmul.mubr.msk.f32.vlgmr.msra.gmra.mrb[6].mxu0 %vm902_vm5, %v885_v61  ;;  %3115 = vmatprep.subr.bf16.mxu1 %v3294_v0  ;;  %v3089_v56 = vpack.c.bf16 %v2266_v53, %v2264_v52  ;;  %v2317_v52 = vld [vmem:[%s3446_s27 + $0x2d0] sm:$0xff]  ;;  %v2318_v53 = vld [vmem:[%s3446_s27 + $0x2d8] sm:$0xff] }
 0x210   :  { %2979 = vmatpush3.bf16.msra.mxu0 %v2978_v60  ;;  %2705 = vmatprep.mubr.msk.f32.mxu0 %vm3296_vm0, %v3297_v1  ;;  %v2199_v60 = vld [vmem:[%s3525_s13 + $0xf0] sm:$0xff] }
 0x211   :  { %2980 = vmatprep.subr.bf16.mxu0 %v3294_v0  ;;  %v3015_v61 = vpack.c.bf16 %v2199_v60, %v2197_v59  ;;  %v2268_v59 = vld [vmem:[%s3525_s13 + $0x1e8] sm:$0xff]  ;;  %v2270_v60 = vld [vmem:[%s3525_s13 + $0x1f8] sm:$0xff] }
 0x212   :  { %3117 = vmatpush3.bf16.msra.mxu1 %v3116_v2  ;;  %v3041_v2 = vpack.c.bf16 %v2223_v63, %v2221_v62  ;;  %v3093_v62 = vpack.c.bf16 %v2270_v60, %v2268_v59  ;;  %v2267_v63 = vld [vmem:[%s3525_s13 + $0x1e0] sm:$0xff]  ;;  %v2321_v59 = vld [vmem:[%s3446_s27 + $0x2f0] sm:$0xff]  ;;  %v2322_v60 = vld [vmem:[%s3446_s27 + $0x2f8] sm:$0xff] }
 0x213   :  { %3118 = vmatprep.subr.bf16.mxu1 %v3294_v0 }
 0x214   :  { %2982 = vmatpush3.bf16.msra.mxu0 %v2981_v6 }
 0x215   :  { %2983 = vmatprep.subr.bf16.mxu0 %v3294_v0 }
 0x216   :  { %3120 = vmatpush3.bf16.msra.mxu1 %v3119_v10  ;;  %v2220_v10 = vld [vmem:[%s3525_s13 + $0x100] sm:$0xff] }
 0x218   :  { %2985 = vmatpush3.bf16.msra.mxu0 %v2984_v11  ;;  %v2222_v11 = vld [vmem:[%s3525_s13 + $0x110] sm:$0xff] }
 0x219   :  { %2986 = vmatprep.subr.bf16.mxu0 %v3294_v0  ;;  %2811 = vmatmul.mubr.f32.vlgmr.msra.gmra.mrb[12].mxu1 %v710_v14  ;;  %v2227_v14 = vld [vmem:[%s3525_s13 + $0x138] sm:$0xff]  ;;  %v3043_v16 = vpack.c.bf16 %v2222_v11, %v2220_v10  ;;  %v2290_v11 = vld [vmem:[%s3525_s13 + $0x200] sm:$0xff] }
 0x21a   :  { %v3045_v19 = vpack.c.bf16 %v2227_v14, %v2225_v13  ;;  %v2295_v13 = vld [vmem:[%s3525_s13 + $0x228] sm:$0xff]  ;;  %v2297_v14 = vld [vmem:[%s3525_s13 + $0x238] sm:$0xff] }
 0x21c   :  { %2988 = vmatpush3.bf16.msra.mxu0 %v2987_v15 }
 0x21d   :  { %2989 = vmatprep.subr.bf16.mxu0 %v3294_v0 }
 0x220   :  { %2991 = vmatpush3.bf16.msra.mxu0 %v2990_v17 }
 0x221   :  { %2992 = vmatprep.subr.bf16.mxu0 %v3294_v0 }
 0x224   :  { %2994 = vmatpush3.bf16.msra.mxu0 %v2993_v21  ;;  %v2226_v21 = vld [vmem:[%s3525_s13 + $0x130] sm:$0xff] }
 0x225   :  { %2995 = vmatprep.subr.bf16.mxu0 %v3294_v0  ;;  %v3047_v25 = vpack.c.bf16 %v2226_v21, %v2224_v20  ;;  %v2299_v20 = vld [vmem:[%s3525_s13 + $0x248] sm:$0xff] }
 0x228   :  { %2997 = vmatpush3.bf16.msra.mxu0 %v2996_v30  ;;  %v2233_v30 = vld [vmem:[%s3525_s13 + $0x168] sm:$0xff] }
 0x229   :  { %2998 = vmatprep.subr.bf16.mxu0 %v3294_v0  ;;  %v3053_v34 = vpack.c.bf16 %v2235_v31, %v2233_v30  ;;  %v2289_v30 = vld [vmem:[%s3595_s25 + $0x4] ss:$0 sm:$0xff] }
 0x22c   :  { %3000 = vmatpush3.bf16.msra.mxu0 %v2999_v35  ;;  %v2232_v35 = vld [vmem:[%s3525_s13 + $0x160] sm:$0xff] }
 0x22d   :  { %3002 = vmatprep.subr.bf16.mxu0 %v3001_v40 }
 0x22f   :  { %2706 = vmatmul.mubr.f32.vlgmr.msra.gmra.mrb[8].mxu0 %v310_v36  ;;  %v2234_v36 = vld [vmem:[%s3525_s13 + $0x170] sm:$0xff] }
 0x230   :  { %1170 = vmatprep.mubr.f32.mxu0 %v3297_v1  ;;  %3004 = vmatpush1.bf16.msra.mxu0 %v3003_v44  ;;  %v3055_v40 = vpack.c.bf16 %v2234_v36, %v2232_v35  ;;  %v2257_v44 = vld [vmem:[%s3525_s13 + $0x190] sm:$0xff] }
 0x231   :  { %3006 = vmatprep.subr.bf16.mxu0 %v3005_v45  ;;  %v2260_v45 = vld [vmem:[%s3525_s13 + $0x1a8] sm:$0xff]  ;;  %v3083_v47 = vpack.c.bf16 %v2257_v44, %v2255_v43  ;;  %v2311_v43 = vld [vmem:[%s3446_s27 + $0x2a0] sm:$0xff] }
 0x232   :  { %v3085_v49 = vpack.c.bf16 %v2262_v46, %v2260_v45  ;;  %v2312_v44 = vld [vmem:[%s3446_s27 + $0x2a8] sm:$0xff]  ;;  %v2313_v46 = vld [vmem:[%s3446_s27 + $0x2b0] sm:$0xff] }
 0x233   :  { %v3144_v45 = vpack.c.bf16 %v2312_v44, %v2311_v43 }
 0x234   :  { %3008 = vmatpush1.bf16.msra.mxu0 %v3007_v50  ;;  %v2259_v50 = vld [vmem:[%s3525_s13 + $0x1a0] sm:$0xff] }
 0x235   :  { %3010 = vmatprep.subr.bf16.mxu0 %v3009_v51  ;;  %v2261_v51 = vld [vmem:[%s3525_s13 + $0x1b0] sm:$0xff] }
 0x238   :  { %3012 = vmatpush1.bf16.msra.mxu0 %v3011_v55  ;;  %v3087_v55 = vpack.c.bf16 %v2261_v51, %v2259_v50  ;;  %v2316_v50 = vld [vmem:[%s3446_s27 + $0x2c8] sm:$0xff] }
 0x239   :  { %3014 = vmatprep.subr.bf16.mxu0 %v3013_v58  ;;  %v2265_v58 = vld [vmem:[%s3525_s13 + $0x1d0] sm:$0xff] }
 0x23c   :  { %3016 = vmatpush1.bf16.msra.mxu0 %v3015_v61  ;;  %v3091_v61 = vpack.c.bf16 %v2265_v58, %v2263_v57  ;;  %v2320_v57 = vld [vmem:[%s3446_s27 + $0x2e8] sm:$0xff] }
 0x23d   :  { %3042 = vmatprep.subr.bf16.mxu0 %v3041_v2  ;;  %v2269_v2 = vld [vmem:[%s3525_s13 + $0x1f0] sm:$0xff] }
 0x2ac   :  { %v1270_v3 = vpop.f32.mrb[8].mxu1 }
 0x2ad   :  { %v2742_v4 = vpop.f32.mrb[9].mxu1  ;;  %v1271_v41 = vadd.f32 %v2219_v37, %v1270_v3  ;;  %v2254_v3 = vld [vmem:[%s3595_s25 + $0x3] ss:$0 sm:$0xff] }
 0x2ae   :  { %v2291_v4 = vld [vmem:[%s3525_s13 + $0x208] sm:$0xff]  ;;  %v2307_v37 = vld [vmem:[%s3446_s27 + $0x280] sm:$0xff] }
 0x2af   :  { %v1274_v48 = vmax.f32 %v1271_v41, 0.0  ;;  %v2309_v41 = vld [vmem:[%s3446_s27 + $0x290] sm:$0xff] }
 0x2cc   :  { %v3666_v5 = vpop.f32.mrb[10].mxu1 }
 0x2cd   :  { %v2777_v6 = vpop.f32.mrb[11].mxu1 }
 0x2ce   :  { %v2293_v6 = vld [vmem:[%s3525_s13 + $0x218] sm:$0xff] }
 0x2cf   :  { %v3121_v10 = vpack.c.bf16 %v2293_v6, %v2291_v4  ;;  %v2325_v6 = vld [vmem:[%s3525_s13 + $0x280] sm:$0xff] }
 0x2ec   :  { %v3668_v7 = vpop.f32.mrb[12].mxu1 }
 0x2ed   :  { %v2812_v8 = vpop.f32.mrb[13].mxu1  ;;  %v1649_v35 = vadd.f32 %v2289_v30, %v3668_v7 }
 0x2ee   :  { %v3095_v8 = vpack.c.bf16 %v2269_v2, %v2267_v63  ;;  %v2328_v63 = vld [vmem:[%s3525_s13 + $0x298] sm:$0xff]  ;;  %v3159_v2 = vpack.c.bf16 %v2322_v60, %v2321_v59 }
 0x2ef   :  { %v1652_v39 = vmax.f32 %v1649_v35, 0.0 }
 0x302   :  { %v1081_v12 = vpop.f32.mrb[8].mxu0 }
 0x303   :  { %v1082_v15 = vadd.f32 %v2184_v9, %v1081_v12  ;;  %v2707_v54 = vpop.f32.mrb[9].mxu0  ;;  %v1460_v9 = vadd.f32 %v2254_v3, %v3666_v5  ;;  %v2292_v12 = vld [vmem:[%s3525_s13 + $0x210] sm:$0xff]  ;;  %v2301_v5 = vld [vmem:[%s3525_s13 + $0x258] sm:$0xff] }
 0x304   :  { %v3129_v23 = vpack.c.bf16 %v2301_v5, %v2299_v20  ;;  %v2335_v20 = vld [vmem:[%s3525_s13 + $0x2d0] sm:$0xff] }
 0x305   :  { %v1085_v17 = vmax.f32 %v1082_v15, 0.0  ;;  %v3123_v15 = vpack.c.bf16 %v2292_v12, %v2290_v11  ;;  %v1463_v54 = vmax.f32 %v1460_v9, 0.0  ;;  %v2330_v9 = vld [vmem:[%s3525_s13 + $0x2a8] sm:$0xff] }
 0x307   :  { %2201 = vmatmul.mubr.msk.f32.vlgmr.msra.gmra.mrb[6].mxu0 %vm902_vm5, %v1085_v17  ;;  %v2294_v17 = vld [vmem:[%s3525_s13 + $0x220] sm:$0xff] }
 0x308   :  { %3044 = vmatpush1.bf16.msra.mxu0 %v3043_v16  ;;  %1359 = vmatprep.mubr.f32.mxu0 %v3297_v1  ;;  %v3125_v16 = vpack.c.bf16 %v2297_v14, %v2295_v13  ;;  %v2329_v14 = vld [vmem:[%s3525_s13 + $0x2a0] sm:$0xff] }
 0x309   :  { %3046 = vmatprep.subr.bf16.mxu0 %v3045_v19  ;;  %v2296_v19 = vld [vmem:[%s3525_s13 + $0x230] sm:$0xff] }
 0x30a   :  { %v3127_v21 = vpack.c.bf16 %v2296_v19, %v2294_v17  ;;  %v2333_v19 = vld [vmem:[%s3525_s13 + $0x2c0] sm:$0xff] }
 0x30b   :  { %v3171_v5 = vpack.c.bf16 %v2335_v20, %v2333_v19 }
 0x30c   :  { %3048 = vmatpush1.bf16.msra.mxu0 %v3047_v25  ;;  %v2300_v25 = vld [vmem:[%s3525_s13 + $0x250] sm:$0xff] }
 0x30d   :  { %3050 = vmatprep.subr.bf16.mxu0 %v3049_v27  ;;  %v2303_v27 = vld [vmem:[%s3525_s13 + $0x268] sm:$0xff]  ;;  %v3131_v29 = vpack.c.bf16 %v2300_v25, %v2298_v24  ;;  %v2337_v25 = vld [vmem:[%s3525_s13 + $0x2e0] sm:$0xff] }
 0x30e   :  { %v3133_v31 = vpack.c.bf16 %v2305_v28, %v2303_v27  ;;  %v2339_v27 = vld [vmem:[%s3525_s13 + $0x2f0] sm:$0xff] }
 0x30f   :  { %v3175_v28 = vpack.c.bf16 %v2339_v27, %v2337_v25 }
 0x310   :  { %3052 = vmatpush1.bf16.msra.mxu0 %v3051_v32  ;;  %v2302_v32 = vld [vmem:[%s3525_s13 + $0x260] sm:$0xff] }
 0x311   :  { %3054 = vmatprep.subr.bf16.mxu0 %v3053_v34  ;;  %v2304_v34 = vld [vmem:[%s3525_s13 + $0x270] sm:$0xff] }
 0x312   :  { %v3135_v36 = vpack.c.bf16 %v2304_v34, %v2302_v32 }
 0x314   :  { %3056 = vmatpush1.bf16.msra.mxu0 %v3055_v40  ;;  %v3138_v40 = vpack.c.bf16 %v2308_v38, %v2307_v37 }
 0x315   :  { %3082 = vmatprep.subr.bf16.mxu0 %v3081_v42  ;;  %v2310_v42 = vld [vmem:[%s3446_s27 + $0x298] sm:$0xff] }
 0x316   :  { %v3141_v7 = vpack.c.bf16 %v2310_v42, %v2309_v41 }
 0x317   :  { %2236 = vmatmul.mubr.msk.f32.vlgmr.msra.gmra.mrb[6].mxu0 %vm902_vm5, %v1274_v48 }
 0x318   :  { %3084 = vmatpush1.bf16.msra.mxu0 %v3083_v47  ;;  %1548 = vmatprep.mubr.f32.mxu0 %v3297_v1  ;;  %v2314_v47 = vld [vmem:[%s3446_s27 + $0x2b8] sm:$0xff] }
 0x319   :  { %3086 = vmatprep.subr.bf16.mxu0 %v3085_v49  ;;  %v3147_v48 = vpack.c.bf16 %v2314_v47, %v2313_v46  ;;  %v2315_v49 = vld [vmem:[%s3446_s27 + $0x2c0] sm:$0xff] }
 0x31a   :  { %v3150_v51 = vpack.c.bf16 %v2316_v50, %v2315_v49 }
 0x31c   :  { %3088 = vmatpush1.bf16.msra.mxu0 %v3087_v55  ;;  %v3153_v55 = vpack.c.bf16 %v2318_v53, %v2317_v52 }
 0x31d   :  { %3090 = vmatprep.subr.bf16.mxu0 %v3089_v56  ;;  %v2319_v56 = vld [vmem:[%s3446_s27 + $0x2e0] sm:$0xff]  ;;  %s3325_s27 = smov 26  }
 0x31e   :  { %v3156_v58 = vpack.c.bf16 %v2320_v57, %v2319_v56  ;;  %s3779_s16 = sld [smem:[%s3869_s0 + %s3325_s27]]  }
 0x320   :  { %3092 = vmatpush1.bf16.msra.mxu0 %v3091_v61  ;;  %v2163_v61 = vld [vmem:[%s2139_s12] ss:$0 sm:$0xff] }
 0x321   :  { %3094 = vmatprep.subr.bf16.mxu0 %v3093_v62  ;;  %v2326_v62 = vld [vmem:[%s3525_s13 + $0x288] sm:$0xff]  ;;  %v788_v3 = vadd.f32 %v2163_v61, %v3570_v18  ;;  %v2336_v18 = vld [vmem:[%s3525_s13 + $0x2d8] sm:$0xff] }
 0x322   :  { %v3161_v4 = vpack.c.bf16 %v2328_v63, %v2326_v62 }
 0x323   :  { %v791_v12 = vmax.f32 %v788_v3, 0.0 }
 0x324   :  { %3096 = vmatpush1.bf16.msra.mxu0 %v3095_v8  ;;  %v2327_v8 = vld [vmem:[%s3525_s13 + $0x290] sm:$0xff]  ;;  %v208_v30 = vld [vmem:[%s3779_s16 + $0x88] sm:$0xff]  ;;  %v211_v41 = vld [vmem:[%s3779_s16 + $0xa0] sm:$0xff] }
 0x325   :  { %3122 = vmatprep.subr.bf16.mxu0 %v3121_v10  ;;  %v2332_v10 = vld [vmem:[%s3525_s13 + $0x2b8] sm:$0xff]  ;;  %v3163_v11 = vpack.c.bf16 %v2327_v8, %v2325_v6  ;;  %v192_v34 = vld [vmem:[%s3779_s16 + $0x8] sm:$0xff]  ;;  %v209_v35 = vld [vmem:[%s3779_s16 + $0x90] sm:$0xff] }
 0x326   :  { %v3165_v13 = vpack.c.bf16 %v2332_v10, %v2330_v9  ;;  %v212_v42 = vld [vmem:[%s3779_s16 + $0xa8] sm:$0xff]  ;;  %v195_v44 = vld [vmem:[%s3779_s16 + $0x20] sm:$0xff]  ;;  %v213_v46 = vld [vmem:[%s3779_s16 + $0xb0] sm:$0xff] }
 0x327   :  { %2271 = vmatmul.mubr.msk.f32.vlgmr.msra.gmra.mrb[6].mxu0 %vm902_vm5, %v1463_v54  ;;  %v2334_v54 = vld [vmem:[%s3525_s13 + $0x2c8] sm:$0xff]  ;;  %v3185_v43 = vpack.c.bf16 %v212_v42, %v211_v41  ;;  %v214_v47 = vld [vmem:[%s3779_s16 + $0xb8] sm:$0xff]  ;;  %v197_v50 = vld [vmem:[%s3779_s16 + $0x30] sm:$0xff] }
 0x328   :  { %3124 = vmatpush1.bf16.msra.mxu0 %v3123_v15  ;;  %1737 = vmatprep.mubr.f32.mxu0 %v3297_v1  ;;  %v2331_v15 = vld [vmem:[%s3525_s13 + $0x2b0] sm:$0xff]  ;;  %v3169_v17 = vpack.c.bf16 %v2336_v18, %v2334_v54  ;;  %v3189_v49 = vpack.c.bf16 %v214_v47, %v213_v46  ;;  %v215_v52 = vld [vmem:[%s3779_s16 + $0xc0] sm:$0xff]  ;;  %v216_v53 = vld [vmem:[%s3779_s16 + $0xc8] sm:$0xff] }
 0x329   :  { %3126 = vmatprep.subr.bf16.mxu0 %v3125_v16  ;;  %v3167_v16 = vpack.c.bf16 %v2331_v15, %v2329_v14  ;;  %v3193_v56 = vpack.c.bf16 %v216_v53, %v215_v52  ;;  %v199_v57 = vld [vmem:[%s3779_s16 + $0x40] sm:$0xff]  ;;  %v217_v59 = vld [vmem:[%s3779_s16 + $0xd0] sm:$0xff]  ;;  %v218_v60 = vld [vmem:[%s3779_s16 + $0xd8] sm:$0xff] }
 0x32a   :  { %v3197_v62 = vpack.c.bf16 %v218_v60, %v217_v59  ;;  %v201_v63 = vld [vmem:[%s3779_s16 + $0x50] sm:$0xff]  ;;  %v219_v3 = vld [vmem:[%s3779_s16 + $0xe0] sm:$0xff]  ;;  %v204_v15 = vld [vmem:[%s3779_s16 + $0x68] sm:$0xff] }
 0x32b   :  { %v2324_v9 = vld [vmem:[%s3595_s25 + $0x5] ss:$0 sm:$0xff]  ;;  %v221_v18 = vld [vmem:[%s3779_s16 + $0xf0] sm:$0xff]  ;;  %v206_v20 = vld [vmem:[%s3779_s16 + $0x78] sm:$0xff] }
 0x32c   :  { %3128 = vmatpush1.bf16.msra.mxu0 %v3127_v21  ;;  %v2338_v21 = vld [vmem:[%s3525_s13 + $0x2e8] sm:$0xff]  ;;  %v203_v14 = vld [vmem:[%s3779_s16 + $0x60] sm:$0xff]  ;;  %v205_v19 = vld [vmem:[%s3779_s16 + $0x70] sm:$0xff] }
 0x32d   :  { %3130 = vmatprep.subr.bf16.mxu0 %v3129_v23  ;;  %v2340_v23 = vld [vmem:[%s3525_s13 + $0x2f8] sm:$0xff]  ;;  %v3203_v54 = vpack.c.bf16 %v204_v15, %v203_v14  ;;  %s3326_s13 = smov 25   ;;  %v232_v42 = vld [vmem:[%s3822_s23 + $0x40] sm:$0xff]  ;;  %v237_v47 = vld [vmem:[%s3822_s23 + $0x68] sm:$0xff] }
 0x32e   :  { %v3173_v24 = vpack.c.bf16 %v2340_v23, %v2338_v21  ;;  %s2143_s19 = sld [smem:[%s3869_s0 + %s3326_s13]]   ;;  %v236_v46 = vld [vmem:[%s3822_s23 + $0x60] sm:$0xff] }
 0x32f   :  { %v2342_v53 = vld [vmem:[%s2145_s28] ss:$0 sm:$0xff] }
 0x330   :  { %3132 = vmatpush1.bf16.msra.mxu0 %v3131_v29  ;;  %v207_v29 = vld [vmem:[%s3779_s16 + $0x80] sm:$0xff] }
 0x331   :  { %3134 = vmatprep.subr.bf16.mxu0 %v3133_v31  ;;  %v191_v31 = vld [vmem:[%s3779_s16] sm:$0xff]  ;;  %v3177_v32 = vpack.c.bf16 %v208_v30, %v207_v29  ;;  %v225_v30 = vld [vmem:[%s3822_s23 + $0x8] sm:$0xff] }
 0x332   :  { %v3179_v37 = vpack.c.bf16 %v192_v34, %v191_v31  ;;  %v224_v29 = vld [vmem:[%s3822_s23] sm:$0xff] }
 0x333   :  { %3178 = vmatprep.subr.bf16.mxu1 %v3177_v32  ;;  %v3210_v34 = vpack.c.bf16 %v225_v30, %v224_v29  ;;  %v2343_v59 = vld [vmem:[%s2147_s6] ss:$0 sm:$0xff] }
 0x334   :  { %3136 = vmatpush1.bf16.msra.mxu0 %v3135_v36  ;;  %v210_v36 = vld [vmem:[%s3779_s16 + $0x98] sm:$0xff]  ;;  %3180 = vmatpush3.bf16.msra.mxu1 %v3179_v37  ;;  %v190_v21 = vld [vmem:[%s2143_s19] sm:$0x3] }
 0x335   :  { %3137 = vmatprep.subr.bf16.mxu0 %v3294_v0  ;;  %v3181_v38 = vpack.c.bf16 %v210_v36, %v209_v35  ;;  %v981_v23 = vrot.slane %v190_v21, %v250_v26  ;;  %v226_v36 = vld [vmem:[%s3822_s23 + $0x10] sm:$0xff]  ;;  %v227_v37 = vld [vmem:[%s3822_s23 + $0x18] sm:$0xff]  ;;  %v228_v26 = vld [vmem:[%s3822_s23 + $0x20] sm:$0xff] }
 0x336   :  { %v3213_v22 = vpack.c.bf16 %v227_v37, %v226_v36 }
 0x337   :  { %2306 = vmatmul.mubr.msk.f32.vlgmr.msra.gmra.mrb[6].mxu0 %vm902_vm5, %v1652_v39  ;;  %v193_v39 = vld [vmem:[%s3779_s16 + $0x10] sm:$0xff]  ;;  %3182 = vmatprep.subr.bf16.mxu1 %v3181_v38 }
 0x338   :  { %3139 = vmatpush3.bf16.msra.mxu0 %v3138_v40  ;;  %2845 = vmatprep.mubr.msk.f32.mxu0 %vm3296_vm0, %v3297_v1  ;;  %v194_v40 = vld [vmem:[%s3779_s16 + $0x18] sm:$0xff] }
 0x339   :  { %3140 = vmatprep.subr.bf16.mxu0 %v3294_v0 }
 0x33c   :  { %3142 = vmatpush3.bf16.msra.mxu0 %v3141_v7  ;;  %v3183_v7 = vpack.c.bf16 %v194_v40, %v193_v39  ;;  %v230_v39 = vld [vmem:[%s3822_s23 + $0x30] sm:$0xff]  ;;  %v231_v40 = vld [vmem:[%s3822_s23 + $0x38] sm:$0xff] }
 0x33d   :  { %3143 = vmatprep.subr.bf16.mxu0 %v3294_v0  ;;  %v3219_v41 = vpack.c.bf16 %v231_v40, %v230_v39 }
 0x33e   :  { %3184 = vmatpush3.bf16.msra.mxu1 %v3183_v7 }
 0x33f   :  { %3186 = vmatprep.subr.bf16.mxu1 %v3185_v43  ;;  %v234_v43 = vld [vmem:[%s3822_s23 + $0x50] sm:$0xff] }
 0x340   :  { %3145 = vmatpush3.bf16.msra.mxu0 %v3144_v45  ;;  %v196_v45 = vld [vmem:[%s3779_s16 + $0x28] sm:$0xff] }
 0x341   :  { %3146 = vmatprep.subr.bf16.mxu0 %v3294_v0 }
 0x344   :  { %3148 = vmatpush3.bf16.msra.mxu0 %v3147_v48  ;;  %v3187_v48 = vpack.c.bf16 %v196_v45, %v195_v44  ;;  %v235_v44 = vld [vmem:[%s3822_s23 + $0x58] sm:$0xff] }
 0x345   :  { %3149 = vmatprep.subr.bf16.mxu0 %v3294_v0  ;;  %v3225_v45 = vpack.c.bf16 %v235_v44, %v234_v43 }
 0x346   :  { %3188 = vmatpush3.bf16.msra.mxu1 %v3187_v48  ;;  %v3228_v48 = vpack.c.bf16 %v237_v47, %v236_v46 }
 0x347   :  { %3190 = vmatprep.subr.bf16.mxu1 %v3189_v49  ;;  %v238_v49 = vld [vmem:[%s3822_s23 + $0x70] sm:$0xff] }
 0x348   :  { %3151 = vmatpush3.bf16.msra.mxu0 %v3150_v51  ;;  %v198_v51 = vld [vmem:[%s3779_s16 + $0x38] sm:$0xff] }
 0x349   :  { %3152 = vmatprep.subr.bf16.mxu0 %v3294_v0 }
 0x34c   :  { %3154 = vmatpush3.bf16.msra.mxu0 %v3153_v55  ;;  %v3191_v55 = vpack.c.bf16 %v198_v51, %v197_v50  ;;  %v239_v50 = vld [vmem:[%s3822_s23 + $0x78] sm:$0xff] }
 0x34d   :  { %3155 = vmatprep.subr.bf16.mxu0 %v3294_v0  ;;  %v3231_v51 = vpack.c.bf16 %v239_v50, %v238_v49 }
 0x34e   :  { %3192 = vmatpush3.bf16.msra.mxu1 %v3191_v55 }
 0x34f   :  { %3194 = vmatprep.subr.bf16.mxu1 %v3193_v56 }
 0x350   :  { %3157 = vmatpush3.bf16.msra.mxu0 %v3156_v58  ;;  %v200_v58 = vld [vmem:[%s3779_s16 + $0x48] sm:$0xff] }
 0x351   :  { %3158 = vmatprep.subr.bf16.mxu0 %v3294_v0  ;;  %v3195_v61 = vpack.c.bf16 %v200_v58, %v199_v57 }
 0x353   :  { %3196 = vmatpush3.bf16.msra.mxu1 %v3195_v61 }
 0x354   :  { %3160 = vmatpush3.bf16.msra.mxu0 %v3159_v2  ;;  %v202_v2 = vld [vmem:[%s3779_s16 + $0x58] sm:$0xff]  ;;  %3198 = vmatprep.subr.bf16.mxu1 %v3197_v62 }
 0x355   :  { %3162 = vmatprep.subr.bf16.mxu0 %v3161_v4  ;;  %v220_v4 = vld [vmem:[%s3779_s16 + $0xe8] sm:$0xff]  ;;  %v3199_v6 = vpack.c.bf16 %v202_v2, %v201_v63  ;;  %v2344_v63 = vld [vmem:[%s2148_s10] ss:$0 sm:$0xff] }
 0x356   :  { %v3201_v8 = vpack.c.bf16 %v220_v4, %v219_v3 }
 0x357   :  { %2846 = vmatmul.mubr.f32.vlgmr.msra.gmra.mrb[10].mxu0 %v791_v12  ;;  %3200 = vmatpush3.bf16.msra.mxu1 %v3199_v6 }
 0x358   :  { %3164 = vmatpush1.bf16.msra.mxu0 %v3163_v11  ;;  %1926 = vmatprep.mubr.f32.mxu0 %v3297_v1 }
 0x359   :  { %3166 = vmatprep.subr.bf16.mxu0 %v3165_v13  ;;  %3202 = vmatprep.subr.bf16.mxu1 %v3201_v8 }
 0x35b   :  { %3204 = vmatpush3.bf16.msra.mxu1 %v3203_v54 }
 0x35c   :  { %3168 = vmatpush1.bf16.msra.mxu0 %v3167_v16  ;;  %v222_v16 = vld [vmem:[%s3779_s16 + $0xf8] sm:$0xff] }
 0x35d   :  { %3170 = vmatprep.subr.bf16.mxu0 %v3169_v17  ;;  %v3205_v17 = vpack.c.bf16 %v222_v16, %v221_v18 }
 0x35f   :  { %3206 = vmatprep.subr.bf16.mxu1 %v3205_v17 }
 0x360   :  { %3172 = vmatpush1.bf16.msra.mxu0 %v3171_v5  ;;  %v3207_v5 = vpack.c.bf16 %v206_v20, %v205_v19 }
 0x361   :  { %3174 = vmatprep.subr.bf16.mxu0 %v3173_v24  ;;  %v985_v24 = vrot.slane %v190_v21, %v266_v33  ;;  %v229_v33 = vld [vmem:[%s3822_s23 + $0x28] sm:$0xff] }
 0x362   :  { %3208 = vmatpush3.bf16.msra.mxu1 %v3207_v5  ;;  %v3216_v38 = vpack.c.bf16 %v229_v33, %v228_v26 }
 0x363   :  { %3209 = vmatprep.subr.bf16.mxu1 %v3294_v0 }
 0x364   :  { %3176 = vmatpush1.bf16.msra.mxu0 %v3175_v28 }
 0x42a   :  { %v1837_v10 = vpop.f32.mrb[10].mxu0 }
 0x42b   :  { %v1838_v11 = vadd.f32 %v2324_v9, %v1837_v10  ;;  %v2847_v12 = vpop.f32.mrb[11].mxu0 }
 0x42d   :  { %v1841_v13 = vmax.f32 %v1838_v11, 0.0 }
 0x42f   :  { %2341 = vmatmul.mubr.msk.f32.vlgmr.msra.gmra.mrb[6].mxu0 %vm902_vm5, %v1841_v13 }
 0x502   :  { %v1928_v25 = vpop.f32.mrb[6].mxu0 }
 0x503   :  { %v3233_v27 = vadd.f32 %v1928_v25, %v981_v23  ;;  %v1930_v28 = vpop.f32.mrb[7].mxu0 }
 0x504   :  { %v3234_v31 = vadd.f32 %v1930_v28, %v985_v24 }
 0x505   :  { %v1935_v35 = vmax.f32 %v3233_v27, 0.0 }
 0x506   :  { %v1936_v32 = vmax.f32 %v3234_v31, 0.0 }
 0x508   :  { %2007 = vmatprep.mubr.f32.mxu1 %v1936_v32 }
 0x509   :  { %2008 = vmatmul.mubr.f32.vlgmr.msra.gmra.mrb[14].mxu1 %v1935_v35 }
 0x50a   :  { %3211 = vmatpush3.bf16.msra.mxu1 %v3210_v34  ;;  %2880 = vmatprep.mubr.msk.f32.mxu1 %vm3296_vm0, %v3297_v1  ;;  %v233_v1 = vld [vmem:[%s3822_s23 + $0x48] sm:$0xff] }
 0x50b   :  { %3212 = vmatprep.subr.bf16.mxu1 %v3294_v0  ;;  %v3222_v7 = vpack.c.bf16 %v233_v1, %v232_v42 }
 0x50e   :  { %3214 = vmatpush3.bf16.msra.mxu1 %v3213_v22 }
 0x50f   :  { %3215 = vmatprep.subr.bf16.mxu1 %v3294_v0 }
 0x512   :  { %3217 = vmatpush3.bf16.msra.mxu1 %v3216_v38 }
 0x513   :  { %3218 = vmatprep.subr.bf16.mxu1 %v3294_v0 }
 0x516   :  { %3220 = vmatpush3.bf16.msra.mxu1 %v3219_v41 }
 0x517   :  { %3221 = vmatprep.subr.bf16.mxu1 %v3294_v0 }
 0x51a   :  { %3223 = vmatpush3.bf16.msra.mxu1 %v3222_v7 }
 0x51b   :  { %3224 = vmatprep.subr.bf16.mxu1 %v3294_v0 }
 0x51e   :  { %3226 = vmatpush3.bf16.msra.mxu1 %v3225_v45 }
 0x51f   :  { %3227 = vmatprep.subr.bf16.mxu1 %v3294_v0 }
 0x522   :  { %3229 = vmatpush3.bf16.msra.mxu1 %v3228_v48 }
 0x523   :  { %3230 = vmatprep.subr.bf16.mxu1 %v3294_v0  ;;  %v70_v0 = vstv %s2149_s2 }
 0x524   :  { %71 = vst [vmem:[#allocation2] sm:$0x1] %v70_v0 }
 0x526   :  { %3232 = vmatpush3.bf16.msra.mxu1 %v3231_v51 }
 0x52b   :  { %v2345_v6 = vld [vmem:[#allocation2] ss:$0 sm:$0xff] }
 0x5dc   :  { %v2524_v52 = vpop.f32.mrb[14].mxu1 }
 0x5dd   :  { %v2525_v55 = vpop.f32.mrb[15].mxu1 }
 0x5de   :  { %v2526_v56 = vadd.f32 %v2525_v55, %v2524_v52 }
 0x5e0   :  { %v2010_v57 = vadd.f32 %v2526_v56, %v2342_v53 }
 0x5e2   :  { %v2013_v58 = vmax.f32 %v2010_v57, 0.0 }
 0x5e4   :  { %2881 = vmatmul.mubr.f32.vlgmr.msra.gmra.mrb[16].mxu1 %v2013_v58 }
 0x6b7   :  { %v2086_v60 = vpop.f32.mrb[16].mxu1 }
 0x6b8   :  { %v2087_v61 = vadd.f32 %v2343_v59, %v2086_v60  ;;  %v2882_v62 = vpop.f32.mrb[17].mxu1 }
 0x6ba   :  { %v2090_v2 = vmax.f32 %v2087_v61, 0.0 }
 0x6bc   :  { %v2097_v3 = vmul.f32 %v2344_v63, %v2090_v2 }
 0x6be   :  { %v2098_v4 = vsel %vm902_vm5, %v2097_v3, 0.0 }
 0x6bf   :  { %2099 = vadd.xlane.f32.xlu0 %v2098_v4 }
 0x74c   :  { %v2100_v8 = vpop.xlane.xlu0 %2099 }
 0x74d   :  { %v2107_v9 = vadd.f32 %v2345_v6, %v2100_v8 }
 0x74f   :  { %v2108_v10 = vsub.f32 0.0, %v2107_v9 }
 0x751   :  { %v2109_v11 = vmul.f32 1.442695, %v2108_v10 }
 0x753   :  { %3290 = vpow2.f32 %v2109_v11 }
 0x75d   :  { %v3291_v12 = vpop.eup %3290 }
 0x75e   :  { %v2111_v13 = vadd.f32 1.0, %v3291_v12 }
 0x760   :  { %3292 = vrcp.f32 %v2111_v13 }
 0x76a   :  { %v3293_v14 = vpop.eup %3292 }
 0x76b   :  { %2114 = vst.msk [vmem:[%s2150_s14] sm:$0xff] %vm2113_vm6, %v3293_v14 }

</bundles_post_ra>
